<compile_context>
chip_gen: v7x
topology: tpu7x:2x2x1
jax: 0.10.0
libtpu: 0.0.40
codegen_flags: <defaults>
</compile_context>

<pallas_src>
import functools

import jax
import jax.numpy as jnp
from jax import lax
from jax.experimental import pallas as pl
from jax.experimental.pallas import tpu as pltpu


def _rnn_kernel(x_ref, g0_ref, whh_ref, wih_ref, b_ref, wout_ref, bout_ref,
                y_ref, gfin_ref, g_carry, *, t_total, mask_tail, unroll):
    """One time-chunk of the recurrence (H-major hidden state g = h^T)."""
    tc, batch = x_ref.shape
    hid = whh_ref.shape[0]

    # Initialize the cross-chunk hidden-state carry from h0 on the first chunk.
    @pl.when(pl.program_id(0) == 0)
    def _():
        g_carry[...] = g0_ref[...]

    # Loop-invariant operands; broadcasts hoisted (JAX does not CSE them).
    w_hh = whh_ref[...]                                     # (H, H)
    w_ih_b = jnp.broadcast_to(wih_ref[...], (hid, batch))   # (H, B)
    bias_b = jnp.broadcast_to(b_ref[...], (hid, batch))     # (H, B)
    w_out_b = jnp.broadcast_to(wout_ref[...], (hid, batch)) # (H, B)
    b_out_b = jnp.broadcast_to(bout_ref[...], (1, batch))   # (1, B)

    t0 = pl.program_id(0) * tc

    def step(t, g_prev):
        # Input projection (input_size == 1): a VPU FMA, off the serial path.
        x_row = x_ref[pl.ds(t, 1), :]                       # (1, B)
        pre = (w_ih_b * x_row + bias_b
               + jnp.dot(w_hh, g_prev,
                         preferred_element_type=jnp.float32,
                         precision=lax.Precision.HIGHEST))
        g_new = jnp.tanh(pre)                               # (H, B)
        # Output Linear(H, 1) inline: multiply + sublane reduce (XLU slot).
        y_ref[pl.ds(t, 1), :] = (
            jnp.sum(g_new * w_out_b, axis=0, keepdims=True) + b_out_b)
        if mask_tail:
            # Zero-padded tail steps must not advance the hidden state.
            g_new = jnp.where(t0 + t < t_total, g_new, g_prev)
        return g_new

    g_last = lax.fori_loop(0, tc, step, g_carry[...], unroll=unroll)
    g_carry[...] = g_last
    gfin_ref[...] = g_last


def rnn_forward(x_btf, h_state, params, *, time_chunk=512, unroll=16):
    """x_btf: (B, T, 1) float32; h_state: (1, B, H) float32 or None.

    Returns (y: (B, T, 1), h_state: (1, B, H)) — same as the PyTorch module.
    """
    B, T, I = x_btf.shape
    H = params["weight_hh"].shape[0]
    assert I == 1, "module is defined with input_size=1"

    h0 = (jnp.zeros((B, H), jnp.float32) if h_state is None
          else h_state[0].astype(jnp.float32))
    if T == 0:  # nothing to run
        return jnp.zeros((B, 0, 1), jnp.float32), h0[None]

    # Time-major, squeezed input; weights reshaped for the H-major kernel.
    x_tb = jnp.transpose(x_btf[:, :, 0]).astype(jnp.float32)       # (T, B)
    g0 = jnp.transpose(h0)                                         # (H, B)
    w_hh = params["weight_hh"].astype(jnp.float32)                 # (H, H)
    w_ih = params["weight_ih"].reshape(H, 1).astype(jnp.float32)   # (H, 1)
    bias = (params["bias_ih"] + params["bias_hh"]
            ).reshape(H, 1).astype(jnp.float32)                    # (H, 1)
    w_out = params["out_weight"].reshape(H, 1).astype(jnp.float32) # (H, 1)
    b_out = params["out_bias"].reshape(1, 1).astype(jnp.float32)   # (1, 1)

    # Chunk the time axis so VMEM stays bounded for arbitrary T.
    if T <= time_chunk:
        tc, t_pad = T, T
    else:
        tc = max(8, (time_chunk // 8) * 8)      # sublane-aligned chunk
        t_pad = pl.cdiv(T, tc) * tc
    if t_pad != T:
        x_tb = jnp.pad(x_tb, ((0, t_pad - T), (0, 0)))
    n_chunks = t_pad // tc

    kernel = functools.partial(
        _rnn_kernel, t_total=T, mask_tail=(t_pad != T), unroll=min(tc, unroll))

    y_tb, g_fin = pl.pallas_call(
        kernel,
        grid=(n_chunks,),
        in_specs=[
            pl.BlockSpec((tc, B), lambda c: (c, 0)),   # x chunk, time-major
            pl.BlockSpec((H, B), lambda c: (0, 0)),    # g0 = h0^T
            pl.BlockSpec((H, H), lambda c: (0, 0)),    # W_hh (torch layout)
            pl.BlockSpec((H, 1), lambda c: (0, 0)),    # W_ih
            pl.BlockSpec((H, 1), lambda c: (0, 0)),    # b_ih + b_hh
            pl.BlockSpec((H, 1), lambda c: (0, 0)),    # out.weight^T
            pl.BlockSpec((1, 1), lambda c: (0, 0)),    # out.bias
        ],
        out_specs=[
            pl.BlockSpec((tc, B), lambda c: (c, 0)),   # y chunk, time-major
            pl.BlockSpec((H, B), lambda c: (0, 0)),    # final hidden, H-major
        ],
        out_shape=[
            jax.ShapeDtypeStruct((t_pad, B), jnp.float32),
            jax.ShapeDtypeStruct((H, B), jnp.float32),
        ],
        scratch_shapes=[pltpu.VMEM((H, B), jnp.float32)],   # hidden carry
        compiler_params=pltpu.CompilerParams(
            dimension_semantics=("arbitrary",)),
    )(x_tb, g0, w_hh, w_ih, bias, w_out, b_out)

    y_btf = jnp.transpose(y_tb[:T])[:, :, None]        # (B, T, 1) batch-first
    return y_btf, jnp.transpose(g_fin)[None]           # (1, B, H) like torch


def init_params(key, input_size=1, hidden_size=32):
    # Deterministic init mimicking torch's U(-1/sqrt(H), 1/sqrt(H)), torch layouts.
    ks = jax.random.split(key, 6)
    bound = 1.0 / jnp.sqrt(jnp.float32(hidden_size))
    u = lambda k, shape: jax.random.uniform(k, shape, jnp.float32, -bound, bound)
    return {
        "weight_ih": u(ks[0], (hidden_size, input_size)),   # weight_ih_l0
        "weight_hh": u(ks[1], (hidden_size, hidden_size)),  # weight_hh_l0
        "bias_ih":   u(ks[2], (hidden_size,)),
        "bias_hh":   u(ks[3], (hidden_size,)),
        "out_weight": u(ks[4], (1, hidden_size)),            # out.weight
        "out_bias":   u(ks[5], (1,)),                        # out.bias
    }


def _reference_forward(x_btf, h_state, params):
    # Pure-JAX reference of the same recurrence (batch-major, torch math).
    B, T, _ = x_btf.shape
    H = params["weight_hh"].shape[0]
    h = jnp.zeros((B, H), jnp.float32) if h_state is None else h_state[0]
    w_ih_t = params["weight_ih"].T        # (1, H)
    w_hh_t = params["weight_hh"].T        # (H, H)
    ys = []
    for t in range(T):
        h = jnp.tanh(x_btf[:, t, :] @ w_ih_t + params["bias_ih"]
                     + jnp.dot(h, w_hh_t, precision=lax.Precision.HIGHEST)
                     + params["bias_hh"])
        ys.append(jnp.sum(h * params["out_weight"], axis=-1, keepdims=True)
                  + params["out_bias"])
    return jnp.stack(ys, axis=1), h[None]


if __name__ == "__main__":
    key = jax.random.PRNGKey(0)
    k_param, k_x, k_h = jax.random.split(key, 3)

    B, T, I, H = 2, 8, 1, 32
    params = init_params(k_param, input_size=I, hidden_size=H)
    x = jax.random.normal(k_x, (B, T, I), jnp.float32)
    h_state = jax.random.normal(k_h, (1, B, H), jnp.float32)

    y, h_out = rnn_forward(x, h_state, params)
    y = jax.block_until_ready(y)
    h_out = jax.block_until_ready(h_out)

    # Sanity check against a pure-JAX reference of the same math.
    y_ref, h_ref = _reference_forward(x, h_state, params)
    assert y.shape == (B, T, 1) and h_out.shape == (1, B, H)
    assert jnp.allclose(y, y_ref, atol=1e-4, rtol=1e-4), \
        f"max |dy| = {jnp.max(jnp.abs(y - y_ref))}"
    assert jnp.allclose(h_out, h_ref, atol=1e-4, rtol=1e-4), \
        f"max |dh| = {jnp.max(jnp.abs(h_out - h_ref))}"

    print("KERNEL_OK")
</pallas_src>

<mosaic_0001>
module attributes {stable_mosaic.version = 11 : i64} {
  func.func @_rnn_kernel(%arg0: i32, %arg1: memref<8x2xf32, #tpu.memory_space<vmem>>, %arg2: memref<32x2xf32, #tpu.memory_space<vmem>>, %arg3: memref<32x32xf32, #tpu.memory_space<vmem>>, %arg4: memref<32x1xf32, #tpu.memory_space<vmem>>, %arg5: memref<32x1xf32, #tpu.memory_space<vmem>>, %arg6: memref<32x1xf32, #tpu.memory_space<vmem>>, %arg7: memref<1x1xf32, #tpu.memory_space<vmem>>, %arg8: memref<8x2xf32, #tpu.memory_space<vmem>>, %arg9: memref<32x2xf32, #tpu.memory_space<vmem>>, %arg10: memref<32x2xf32, #tpu.memory_space<vmem>>) attributes {dimension_semantics = [#tpu.dimension_semantics<arbitrary>], iteration_bounds = array<i64: 1>, scalar_prefetch = 0 : i64, scratch_operands = 1 : i64, tpu.core_type = #tpu.core_type<tc>, window_params = [{transform_indices = @transform_0, window_bounds = array<i64: 8, 2>}, {pipeline_mode = #tpu.pipeline_mode<synchronous>, transform_indices = @transform_1, window_bounds = array<i64: 32, 2>}, {pipeline_mode = #tpu.pipeline_mode<synchronous>, transform_indices = @transform_2, window_bounds = array<i64: 32, 32>}, {pipeline_mode = #tpu.pipeline_mode<synchronous>, transform_indices = @transform_3, window_bounds = array<i64: 32, 1>}, {pipeline_mode = #tpu.pipeline_mode<synchronous>, transform_indices = @transform_4, window_bounds = array<i64: 32, 1>}, {pipeline_mode = #tpu.pipeline_mode<synchronous>, transform_indices = @transform_5, window_bounds = array<i64: 32, 1>}, {pipeline_mode = #tpu.pipeline_mode<synchronous>, transform_indices = @transform_6, window_bounds = array<i64: 1, 1>}, {transform_indices = @transform_7, window_bounds = array<i64: 8, 2>}, {pipeline_mode = #tpu.pipeline_mode<synchronous>, transform_indices = @transform_8, window_bounds = array<i64: 32, 2>}]} {
    %c0_i32 = arith.constant 0 : i32
    %0 = arith.cmpi eq, %arg0, %c0_i32 : i32
    %1 = arith.extui %0 : i1 to i32
    %c0_i32_0 = arith.constant 0 : i32
    %2 = arith.cmpi ne, %1, %c0_i32_0 : i32
    scf.if %2 {
      %c0_48 = arith.constant 0 : index
      %c0_49 = arith.constant 0 : index
      %131 = vector.load %arg2[%c0_48, %c0_49] : memref<32x2xf32, #tpu.memory_space<vmem>>, vector<32x2xf32>
      %c0_50 = arith.constant 0 : index
      %c0_51 = arith.constant 0 : index
      %132 = vector.load %arg10[%c0_50, %c0_51] : memref<32x2xf32, #tpu.memory_space<vmem>>, vector<32x2xf32>
      tpu.vector_store %arg10[%c0_50, %c0_51], %131 {strides = array<i32>} : memref<32x2xf32, #tpu.memory_space<vmem>>, vector<32x2xf32>,
    } else {
    }
    %c0 = arith.constant 0 : index
    %c0_1 = arith.constant 0 : index
    %3 = vector.load %arg3[%c0, %c0_1] : memref<32x32xf32, #tpu.memory_space<vmem>>, vector<32x32xf32>
    %c0_2 = arith.constant 0 : index
    %c0_3 = arith.constant 0 : index
    %4 = vector.load %arg4[%c0_2, %c0_3] : memref<32x1xf32, #tpu.memory_space<vmem>>, vector<32x1xf32>
    %5 = vector.shape_cast %4 : vector<32x1xf32> to vector<32x1xf32>
    %6 = vector.broadcast %5 : vector<32x1xf32> to vector<32x2xf32>
    %c0_4 = arith.constant 0 : index
    %c0_5 = arith.constant 0 : index
    %7 = vector.load %arg5[%c0_4, %c0_5] : memref<32x1xf32, #tpu.memory_space<vmem>>, vector<32x1xf32>
    %8 = vector.shape_cast %7 : vector<32x1xf32> to vector<32x1xf32>
    %9 = vector.broadcast %8 : vector<32x1xf32> to vector<32x2xf32>
    %c0_6 = arith.constant 0 : index
    %c0_7 = arith.constant 0 : index
    %10 = vector.load %arg6[%c0_6, %c0_7] : memref<32x1xf32, #tpu.memory_space<vmem>>, vector<32x1xf32>
    %11 = vector.shape_cast %10 : vector<32x1xf32> to vector<32x1xf32>
    %12 = vector.broadcast %11 : vector<32x1xf32> to vector<32x2xf32>
    %c0_8 = arith.constant 0 : index
    %c0_9 = arith.constant 0 : index
    %13 = vector.load %arg7[%c0_8, %c0_9] : memref<1x1xf32, #tpu.memory_space<vmem>>, vector<1x1xf32>
    %14 = vector.shape_cast %13 : vector<1x1xf32> to vector<1x1xf32>
    %15 = vector.broadcast %14 : vector<1x1xf32> to vector<1x2xf32>
    %c0_10 = arith.constant 0 : index
    %c0_11 = arith.constant 0 : index
    %16 = vector.load %arg10[%c0_10, %c0_11] : memref<32x2xf32, #tpu.memory_space<vmem>>, vector<32x2xf32>
    %c0_i32_12 = arith.constant 0 : i32
    %17 = arith.index_cast %c0_i32_12 : i32 to index
    %c0_13 = arith.constant 0 : index
    %18 = vector.load %arg1[%17, %c0_13] : memref<8x2xf32, #tpu.memory_space<vmem>>, vector<1x2xf32>
    %19 = vector.broadcast %18 : vector<1x2xf32> to vector<32x2xf32>
    %20 = arith.mulf %6, %19 : vector<32x2xf32>
    %21 = arith.addf %20, %9 : vector<32x2xf32>
    %cst = arith.constant dense<0.000000e+00> : vector<32x2xf32>
    %22 = tpu.matmul %3, %16, %cst {dimension_numbers = #tpu.dot_dimension_numbers<[1], [0], [0], [1], [0, 0, 1, 1], [], []>, precision = #tpu.contract_precision<fp32>} : vector<32x32xf32>, vector<32x2xf32>, vector<32x2xf32> -> vector<32x2xf32>
    %23 = arith.addf %21, %22 : vector<32x2xf32>
    %24 = math.tanh %23 : vector<32x2xf32>
    %25 = arith.mulf %24, %12 : vector<32x2xf32>
    %cst_14 = arith.constant dense<0.000000e+00> : vector<2xf32>
    %26 = vector.multi_reduction <add>, %25, %cst_14 [0] : vector<32x2xf32> to vector<2xf32>
    %27 = vector.shape_cast %26 : vector<2xf32> to vector<1x2xf32>
    %28 = arith.addf %27, %15 : vector<1x2xf32>
    %29 = arith.index_cast %c0_i32_12 : i32 to index
    %c0_15 = arith.constant 0 : index
    %30 = vector.load %arg8[%29, %c0_15] : memref<8x2xf32, #tpu.memory_space<vmem>>, vector<1x2xf32>
    tpu.vector_store %arg8[%29, %c0_15], %28 {strides = array<i32>} : memref<8x2xf32, #tpu.memory_space<vmem>>, vector<1x2xf32>,
    %c1_i32 = arith.constant 1 : i32
    %31 = arith.index_cast %c1_i32 : i32 to index
    %c0_16 = arith.constant 0 : index
    %32 = vector.load %arg1[%31, %c0_16] : memref<8x2xf32, #tpu.memory_space<vmem>>, vector<1x2xf32>
    %33 = vector.broadcast %32 : vector<1x2xf32> to vector<32x2xf32>
    %34 = arith.mulf %6, %33 : vector<32x2xf32>
    %35 = arith.addf %34, %9 : vector<32x2xf32>
    %cst_17 = arith.constant dense<0.000000e+00> : vector<32x2xf32>
    %36 = tpu.matmul %3, %24, %cst_17 {dimension_numbers = #tpu.dot_dimension_numbers<[1], [0], [0], [1], [0, 0, 1, 1], [], []>, precision = #tpu.contract_precision<fp32>} : vector<32x32xf32>, vector<32x2xf32>, vector<32x2xf32> -> vector<32x2xf32>
    %37 = arith.addf %35, %36 : vector<32x2xf32>
    %38 = math.tanh %37 : vector<32x2xf32>
    %39 = arith.mulf %38, %12 : vector<32x2xf32>
    %cst_18 = arith.constant dense<0.000000e+00> : vector<2xf32>
    %40 = vector.multi_reduction <add>, %39, %cst_18 [0] : vector<32x2xf32> to vector<2xf32>
    %41 = vector.shape_cast %40 : vector<2xf32> to vector<1x2xf32>
    %42 = arith.addf %41, %15 : vector<1x2xf32>
    %43 = arith.index_cast %c1_i32 : i32 to index
    %c0_19 = arith.constant 0 : index
    %44 = vector.load %arg8[%43, %c0_19] : memref<8x2xf32, #tpu.memory_space<vmem>>, vector<1x2xf32>
    tpu.vector_store %arg8[%43, %c0_19], %42 {strides = array<i32>} : memref<8x2xf32, #tpu.memory_space<vmem>>, vector<1x2xf32>,
    %c2_i32 = arith.constant 2 : i32
    %45 = arith.index_cast %c2_i32 : i32 to index
    %c0_20 = arith.constant 0 : index
    %46 = vector.load %arg1[%45, %c0_20] : memref<8x2xf32, #tpu.memory_space<vmem>>, vector<1x2xf32>
    %47 = vector.broadcast %46 : vector<1x2xf32> to vector<32x2xf32>
    %48 = arith.mulf %6, %47 : vector<32x2xf32>
    %49 = arith.addf %48, %9 : vector<32x2xf32>
    %cst_21 = arith.constant dense<0.000000e+00> : vector<32x2xf32>
    %50 = tpu.matmul %3, %38, %cst_21 {dimension_numbers = #tpu.dot_dimension_numbers<[1], [0], [0], [1], [0, 0, 1, 1], [], []>, precision = #tpu.contract_precision<fp32>} : vector<32x32xf32>, vector<32x2xf32>, vector<32x2xf32> -> vector<32x2xf32>
    %51 = arith.addf %49, %50 : vector<32x2xf32>
    %52 = math.tanh %51 : vector<32x2xf32>
    %53 = arith.mulf %52, %12 : vector<32x2xf32>
    %cst_22 = arith.constant dense<0.000000e+00> : vector<2xf32>
    %54 = vector.multi_reduction <add>, %53, %cst_22 [0] : vector<32x2xf32> to vector<2xf32>
    %55 = vector.shape_cast %54 : vector<2xf32> to vector<1x2xf32>
    %56 = arith.addf %55, %15 : vector<1x2xf32>
    %57 = arith.index_cast %c2_i32 : i32 to index
    %c0_23 = arith.constant 0 : index
    %58 = vector.load %arg8[%57, %c0_23] : memref<8x2xf32, #tpu.memory_space<vmem>>, vector<1x2xf32>
    tpu.vector_store %arg8[%57, %c0_23], %56 {strides = array<i32>} : memref<8x2xf32, #tpu.memory_space<vmem>>, vector<1x2xf32>,
    %c3_i32 = arith.constant 3 : i32
    %59 = arith.index_cast %c3_i32 : i32 to index
    %c0_24 = arith.constant 0 : index
    %60 = vector.load %arg1[%59, %c0_24] : memref<8x2xf32, #tpu.memory_space<vmem>>, vector<1x2xf32>
    %61 = vector.broadcast %60 : vector<1x2xf32> to vector<32x2xf32>
    %62 = arith.mulf %6, %61 : vector<32x2xf32>
    %63 = arith.addf %62, %9 : vector<32x2xf32>
    %cst_25 = arith.constant dense<0.000000e+00> : vector<32x2xf32>
    %64 = tpu.matmul %3, %52, %cst_25 {dimension_numbers = #tpu.dot_dimension_numbers<[1], [0], [0], [1], [0, 0, 1, 1], [], []>, precision = #tpu.contract_precision<fp32>} : vector<32x32xf32>, vector<32x2xf32>, vector<32x2xf32> -> vector<32x2xf32>
    %65 = arith.addf %63, %64 : vector<32x2xf32>
    %66 = math.tanh %65 : vector<32x2xf32>
    %67 = arith.mulf %66, %12 : vector<32x2xf32>
    %cst_26 = arith.constant dense<0.000000e+00> : vector<2xf32>
    %68 = vector.multi_reduction <add>, %67, %cst_26 [0] : vector<32x2xf32> to vector<2xf32>
    %69 = vector.shape_cast %68 : vector<2xf32> to vector<1x2xf32>
    %70 = arith.addf %69, %15 : vector<1x2xf32>
    %71 = arith.index_cast %c3_i32 : i32 to index
    %c0_27 = arith.constant 0 : index
    %72 = vector.load %arg8[%71, %c0_27] : memref<8x2xf32, #tpu.memory_space<vmem>>, vector<1x2xf32>
    tpu.vector_store %arg8[%71, %c0_27], %70 {strides = array<i32>} : memref<8x2xf32, #tpu.memory_space<vmem>>, vector<1x2xf32>,
    %c4_i32 = arith.constant 4 : i32
    %73 = arith.index_cast %c4_i32 : i32 to index
    %c0_28 = arith.constant 0 : index
    %74 = vector.load %arg1[%73, %c0_28] : memref<8x2xf32, #tpu.memory_space<vmem>>, vector<1x2xf32>
    %75 = vector.broadcast %74 : vector<1x2xf32> to vector<32x2xf32>
    %76 = arith.mulf %6, %75 : vector<32x2xf32>
    %77 = arith.addf %76, %9 : vector<32x2xf32>
    %cst_29 = arith.constant dense<0.000000e+00> : vector<32x2xf32>
    %78 = tpu.matmul %3, %66, %cst_29 {dimension_numbers = #tpu.dot_dimension_numbers<[1], [0], [0], [1], [0, 0, 1, 1], [], []>, precision = #tpu.contract_precision<fp32>} : vector<32x32xf32>, vector<32x2xf32>, vector<32x2xf32> -> vector<32x2xf32>
    %79 = arith.addf %77, %78 : vector<32x2xf32>
    %80 = math.tanh %79 : vector<32x2xf32>
    %81 = arith.mulf %80, %12 : vector<32x2xf32>
    %cst_30 = arith.constant dense<0.000000e+00> : vector<2xf32>
    %82 = vector.multi_reduction <add>, %81, %cst_30 [0] : vector<32x2xf32> to vector<2xf32>
    %83 = vector.shape_cast %82 : vector<2xf32> to vector<1x2xf32>
    %84 = arith.addf %83, %15 : vector<1x2xf32>
    %85 = arith.index_cast %c4_i32 : i32 to index
    %c0_31 = arith.constant 0 : index
    %86 = vector.load %arg8[%85, %c0_31] : memref<8x2xf32, #tpu.memory_space<vmem>>, vector<1x2xf32>
    tpu.vector_store %arg8[%85, %c0_31], %84 {strides = array<i32>} : memref<8x2xf32, #tpu.memory_space<vmem>>, vector<1x2xf32>,
    %c5_i32 = arith.constant 5 : i32
    %87 = arith.index_cast %c5_i32 : i32 to index
    %c0_32 = arith.constant 0 : index
    %88 = vector.load %arg1[%87, %c0_32] : memref<8x2xf32, #tpu.memory_space<vmem>>, vector<1x2xf32>
    %89 = vector.broadcast %88 : vector<1x2xf32> to vector<32x2xf32>
    %90 = arith.mulf %6, %89 : vector<32x2xf32>
    %91 = arith.addf %90, %9 : vector<32x2xf32>
    %cst_33 = arith.constant dense<0.000000e+00> : vector<32x2xf32>
    %92 = tpu.matmul %3, %80, %cst_33 {dimension_numbers = #tpu.dot_dimension_numbers<[1], [0], [0], [1], [0, 0, 1, 1], [], []>, precision = #tpu.contract_precision<fp32>} : vector<32x32xf32>, vector<32x2xf32>, vector<32x2xf32> -> vector<32x2xf32>
    %93 = arith.addf %91, %92 : vector<32x2xf32>
    %94 = math.tanh %93 : vector<32x2xf32>
    %95 = arith.mulf %94, %12 : vector<32x2xf32>
    %cst_34 = arith.constant dense<0.000000e+00> : vector<2xf32>
    %96 = vector.multi_reduction <add>, %95, %cst_34 [0] : vector<32x2xf32> to vector<2xf32>
    %97 = vector.shape_cast %96 : vector<2xf32> to vector<1x2xf32>
    %98 = arith.addf %97, %15 : vector<1x2xf32>
    %99 = arith.index_cast %c5_i32 : i32 to index
    %c0_35 = arith.constant 0 : index
    %100 = vector.load %arg8[%99, %c0_35] : memref<8x2xf32, #tpu.memory_space<vmem>>, vector<1x2xf32>
    tpu.vector_store %arg8[%99, %c0_35], %98 {strides = array<i32>} : memref<8x2xf32, #tpu.memory_space<vmem>>, vector<1x2xf32>,
    %c6_i32 = arith.constant 6 : i32
    %101 = arith.index_cast %c6_i32 : i32 to index
    %c0_36 = arith.constant 0 : index
    %102 = vector.load %arg1[%101, %c0_36] : memref<8x2xf32, #tpu.memory_space<vmem>>, vector<1x2xf32>
    %103 = vector.broadcast %102 : vector<1x2xf32> to vector<32x2xf32>
    %104 = arith.mulf %6, %103 : vector<32x2xf32>
    %105 = arith.addf %104, %9 : vector<32x2xf32>
    %cst_37 = arith.constant dense<0.000000e+00> : vector<32x2xf32>
    %106 = tpu.matmul %3, %94, %cst_37 {dimension_numbers = #tpu.dot_dimension_numbers<[1], [0], [0], [1], [0, 0, 1, 1], [], []>, precision = #tpu.contract_precision<fp32>} : vector<32x32xf32>, vector<32x2xf32>, vector<32x2xf32> -> vector<32x2xf32>
    %107 = arith.addf %105, %106 : vector<32x2xf32>
    %108 = math.tanh %107 : vector<32x2xf32>
    %109 = arith.mulf %108, %12 : vector<32x2xf32>
    %cst_38 = arith.constant dense<0.000000e+00> : vector<2xf32>
    %110 = vector.multi_reduction <add>, %109, %cst_38 [0] : vector<32x2xf32> to vector<2xf32>
    %111 = vector.shape_cast %110 : vector<2xf32> to vector<1x2xf32>
    %112 = arith.addf %111, %15 : vector<1x2xf32>
    %113 = arith.index_cast %c6_i32 : i32 to index
    %c0_39 = arith.constant 0 : index
    %114 = vector.load %arg8[%113, %c0_39] : memref<8x2xf32, #tpu.memory_space<vmem>>, vector<1x2xf32>
    tpu.vector_store %arg8[%113, %c0_39], %112 {strides = array<i32>} : memref<8x2xf32, #tpu.memory_space<vmem>>, vector<1x2xf32>,
    %c7_i32 = arith.constant 7 : i32
    %115 = arith.index_cast %c7_i32 : i32 to index
    %c0_40 = arith.constant 0 : index
    %116 = vector.load %arg1[%115, %c0_40] : memref<8x2xf32, #tpu.memory_space<vmem>>, vector<1x2xf32>
    %117 = vector.broadcast %116 : vector<1x2xf32> to vector<32x2xf32>
    %118 = arith.mulf %6, %117 : vector<32x2xf32>
    %119 = arith.addf %118, %9 : vector<32x2xf32>
    %cst_41 = arith.constant dense<0.000000e+00> : vector<32x2xf32>
    %120 = tpu.matmul %3, %108, %cst_41 {dimension_numbers = #tpu.dot_dimension_numbers<[1], [0], [0], [1], [0, 0, 1, 1], [], []>, precision = #tpu.contract_precision<fp32>} : vector<32x32xf32>, vector<32x2xf32>, vector<32x2xf32> -> vector<32x2xf32>
    %121 = arith.addf %119, %120 : vector<32x2xf32>
    %122 = math.tanh %121 : vector<32x2xf32>
    %123 = arith.mulf %122, %12 : vector<32x2xf32>
    %cst_42 = arith.constant dense<0.000000e+00> : vector<2xf32>
    %124 = vector.multi_reduction <add>, %123, %cst_42 [0] : vector<32x2xf32> to vector<2xf32>
    %125 = vector.shape_cast %124 : vector<2xf32> to vector<1x2xf32>
    %126 = arith.addf %125, %15 : vector<1x2xf32>
    %127 = arith.index_cast %c7_i32 : i32 to index
    %c0_43 = arith.constant 0 : index
    %128 = vector.load %arg8[%127, %c0_43] : memref<8x2xf32, #tpu.memory_space<vmem>>, vector<1x2xf32>
    tpu.vector_store %arg8[%127, %c0_43], %126 {strides = array<i32>} : memref<8x2xf32, #tpu.memory_space<vmem>>, vector<1x2xf32>,
    %c8_i32 = arith.constant 8 : i32
    %c0_44 = arith.constant 0 : index
    %c0_45 = arith.constant 0 : index
    %129 = vector.load %arg10[%c0_44, %c0_45] : memref<32x2xf32, #tpu.memory_space<vmem>>, vector<32x2xf32>
    tpu.vector_store %arg10[%c0_44, %c0_45], %122 {strides = array<i32>} : memref<32x2xf32, #tpu.memory_space<vmem>>, vector<32x2xf32>,
    %c0_46 = arith.constant 0 : index
    %c0_47 = arith.constant 0 : index
    %130 = vector.load %arg9[%c0_46, %c0_47] : memref<32x2xf32, #tpu.memory_space<vmem>>, vector<32x2xf32>
    tpu.vector_store %arg9[%c0_46, %c0_47], %122 {strides = array<i32>} : memref<32x2xf32, #tpu.memory_space<vmem>>, vector<32x2xf32>,
    return
  }
  func.func @transform_0(%arg0: i32) -> (i32, i32) {
    %c0_i32 = arith.constant 0 : i32
    %c0_i32_0 = arith.constant 0 : i32
    return %arg0, %c0_i32 : i32, i32
  }
  func.func @transform_1(%arg0: i32) -> (i32, i32) {
    %c0_i32 = arith.constant 0 : i32
    %c0_i32_0 = arith.constant 0 : i32
    %c0_i32_1 = arith.constant 0 : i32
    return %c0_i32, %c0_i32_0 : i32, i32
  }
  func.func @transform_2(%arg0: i32) -> (i32, i32) {
    %c0_i32 = arith.constant 0 : i32
    %c0_i32_0 = arith.constant 0 : i32
    %c0_i32_1 = arith.constant 0 : i32
    return %c0_i32, %c0_i32_0 : i32, i32
  }
  func.func @transform_3(%arg0: i32) -> (i32, i32) {
    %c0_i32 = arith.constant 0 : i32
    %c0_i32_0 = arith.constant 0 : i32
    %c0_i32_1 = arith.constant 0 : i32
    return %c0_i32, %c0_i32_0 : i32, i32
  }
  func.func @transform_4(%arg0: i32) -> (i32, i32) {
    %c0_i32 = arith.constant 0 : i32
    %c0_i32_0 = arith.constant 0 : i32
    %c0_i32_1 = arith.constant 0 : i32
    return %c0_i32, %c0_i32_0 : i32, i32
  }
  func.func @transform_5(%arg0: i32) -> (i32, i32) {
    %c0_i32 = arith.constant 0 : i32
    %c0_i32_0 = arith.constant 0 : i32
    %c0_i32_1 = arith.constant 0 : i32
    return %c0_i32, %c0_i32_0 : i32, i32
  }
  func.func @transform_6(%arg0: i32) -> (i32, i32) {
    %c0_i32 = arith.constant 0 : i32
    %c0_i32_0 = arith.constant 0 : i32
    %c0_i32_1 = arith.constant 0 : i32
    return %c0_i32, %c0_i32_0 : i32, i32
  }
  func.func @transform_7(%arg0: i32) -> (i32, i32) {
    %c0_i32 = arith.constant 0 : i32
    %c0_i32_0 = arith.constant 0 : i32
    return %arg0, %c0_i32 : i32, i32
  }
  func.func @transform_8(%arg0: i32) -> (i32, i32) {
    %c0_i32 = arith.constant 0 : i32
    %c0_i32_0 = arith.constant 0 : i32
    %c0_i32_1 = arith.constant 0 : i32
    return %c0_i32, %c0_i32_0 : i32, i32
  }
}

</mosaic_0001>

<bundles_post_ra>
// kernel: tpu_custom_call.1
= control target key start
LH: loop header
LB: loop body
LE: loop exit
PB: predicated region body
PF: predicated region fallthrough
CT: control target
= control target key end

     0   :  { %vm38_vm0 = vcmask 15360   ;;  %vm146_vm1 = vcmask 261120   ;;  %v7071_v3 = vmov 0   ;;  %vm800_vm2 = vcmask 8192   ;;  %s7858_s1 = inlined_call_operand.vmem [shape: f32[32,2], index: 1, kind: input, shape index: {}]   ;;  %s7859_s2 = inlined_call_operand.vmem [shape: f32[32,32], index: 2, kind: input, shape index: {}]   ;;  %s7860_s3 = inlined_call_operand.vmem [shape: f32[32,1], index: 3, kind: input, shape index: {}]   ;;  %s7861_s6 = inlined_call_operand.<no memory space> [shape: f32[1,1], index: 6, kind: input, shape index: {}]   ;;  %s7862_s4 = inlined_call_operand.vmem [shape: f32[32,1], index: 4, kind: input, shape index: {}]   ;;  %s7863_s5 = inlined_call_operand.vmem [shape: f32[32,1], index: 5, kind: input, shape index: {}]   ;;  %s7864_s0 = inlined_call_operand.vmem [shape: f32[8,2], index: 0, kind: input, shape index: {}]   ;;  %s7865_s7 = inlined_call_operand.vmem [shape: f32[8,2], index: 7, kind: output, shape index: {0}]   ;;  %s7866_s8 = inlined_call_operand.vmem [shape: f32[32,2], index: 8, kind: output, shape index: {1}]  }
   0x1   :  { %v34_v0 = vld [vmem:[%s7858_s1] sm:$0xff]  ;;  %v35_v1 = vld [vmem:[%s7858_s1 + $0x8] sm:$0xff]  ;;  %v36_v2 = vld [vmem:[%s7858_s1 + $0x10] sm:$0xff]  ;;  %7005 = vset.pattern.permute.xlu0 %v7071_v3  ;;  %7006 = vset.pattern.permute.xlu1 %v7071_v3  ;;  %v14_v4 = vstv %s7861_s6 }
   0x2   :  { %39 = vst.msk [vmem:[#allocation2] sm:$0xff] %vm38_vm0, %v34_v0  ;;  %40 = vst.msk [vmem:[#allocation2 + $0x8] sm:$0xff] %vm38_vm0, %v35_v1  ;;  %v37_v5 = vld [vmem:[%s7858_s1 + $0x18] sm:$0xff]  ;;  %v43_v6 = vld [vmem:[%s7859_s2] sm:$0xff] }
   0x3   :  { %41 = vst.msk [vmem:[#allocation2 + $0x10] sm:$0xff] %vm38_vm0, %v36_v2  ;;  %v44_v7 = vld [vmem:[%s7859_s2 + $0x8] sm:$0xff]  ;;  %15 = vst [vmem:[#allocation3] sm:$0x1] %v14_v4  ;;  %v148_v8 = vsel %vm146_vm1, %v43_v6, 0  ;;  %v45_v10 = vld [vmem:[%s7859_s2 + $0x10] sm:$0xff] }
   0x4   :  { %42 = vst.msk [vmem:[#allocation2 + $0x18] sm:$0xff] %vm38_vm0, %v37_v5  ;;  %v151_v9 = vsel %vm146_vm1, %v44_v7, 0  ;;  %v46_v11 = vld [vmem:[%s7859_s2 + $0x18] sm:$0xff]  ;;  %v47_v12 = vld [vmem:[%s7860_s3] sm:$0xff]  ;;  %v7153_v13 = vand.u32 4294901760, %v148_v8  ;;  %v154_v15 = vsel %vm146_vm1, %v45_v10, 0 }
   0x5   :  { %v7155_v14 = vand.u32 4294901760, %v151_v9  ;;  %v157_v16 = vsel %vm146_vm1, %v46_v11, 0  ;;  %53 = vperm.xlu0 %7005, %v47_v12   ;;  %v71_v17 = vld [vmem:[%s7862_s4] sm:$0xff]  ;;  %v7162_v18 = vand.u32 4294901760, %v154_v15  ;;  %v48_v20 = vld [vmem:[%s7860_s3 + $0x8] sm:$0xff]  ;;  %v49_v26 = vld [vmem:[%s7860_s3 + $0x10] sm:$0xff] }
   0x6   :  { %v7164_v19 = vand.u32 4294901760, %v157_v16  ;;  %77 = vperm.xlu1 %7006, %v71_v17   ;;  %v7170_v21 = vsub.f32 %v148_v8, %v7153_v13  ;;  %v72_v23 = vld [vmem:[%s7862_s4 + $0x8] sm:$0xff]  ;;  %v50_v37 = vld [vmem:[%s7860_s3 + $0x18] sm:$0xff]  ;;  %v73_v47 = vld [vmem:[%s7862_s4 + $0x10] sm:$0xff] }
   0x7   :  { %v7173_v22 = vsub.f32 %v151_v9, %v7155_v14  ;;  %v7179_v24 = vsub.f32 %v154_v15, %v7162_v18  ;;  %v74_v52 = vld [vmem:[%s7862_s4 + $0x18] sm:$0xff]  ;;  %v95_v60 = vld [vmem:[%s7863_s5] sm:$0xff]  ;;  %v96_v1 = vld [vmem:[%s7863_s5 + $0x8] sm:$0xff] }
   0x8   :  { %v7182_v25 = vand.u32 4294901760, %v7170_v21  ;;  %v7191_v31 = vsub.f32 %v157_v16, %v7164_v19  ;;  %v97_v6 = vld [vmem:[%s7863_s5 + $0x10] sm:$0xff]  ;;  %v98_v9 = vld [vmem:[%s7863_s5 + $0x18] sm:$0xff] }
   0x9   :  { %58 = vperm.xlu0 %7005, %v48_v20   ;;  %v129_v27 = vld [vmem:[#allocation2] sm:$0xff]  ;;  %v130_v28 = vld [vmem:[#allocation2 + $0x8] sm:$0xff]  ;;  %v7188_v30 = vand.u32 4294901760, %v7173_v22  ;;  %v7199_v39 = vand.u32 4294901760, %v7179_v24 }
   0xa   :  { %v131_v29 = vld [vmem:[#allocation2 + $0x10] sm:$0xff]  ;;  %82 = vperm.xlu1 %7006, %v72_v23   ;;  %v160_v32 = vand.u32 4294901760, %v129_v27  ;;  %v163_v33 = vand.u32 4294901760, %v130_v28  ;;  %v231_v36 = vsub.f32 %v7170_v21, %v7182_v25  ;;  %v7214_v46 = vand.u32 4294901760, %v7191_v31  ;;  %v119_v11 = vld [vmem:[#allocation3] sm:$0x1] }
   0xb   :  { %v132_v34 = vld [vmem:[#allocation2 + $0x18] sm:$0xff]  ;;  %v166_v35 = vand.u32 4294901760, %v131_v29  ;;  %v241_v45 = vsub.f32 %v7173_v22, %v7188_v30  ;;  %v251_v53 = vsub.f32 %v7179_v24, %v7199_v39 }
   0xc   :  { %v169_v38 = vand.u32 4294901760, %v132_v34  ;;  %v7201_v40 = vpack.c.bf16 %v163_v33, %v160_v32  ;;  %v7203_v41 = vand.u32 4294901760, %v231_v36  ;;  %v7205_v42 = vsub.f32 %v129_v27, %v160_v32  ;;  %v5398_v27 = vld [vmem:[%s7864_s0 + $0x2] ss:$0 sm:$0xff] }
   0xd   :  { %v7207_v43 = vsub.f32 %v130_v28, %v163_v33  ;;  %63 = vperm.xlu0 %7005, %v49_v26   ;;  %v7223_v50 = vsub.f32 %v131_v29, %v166_v35  ;;  %v7239_v58 = vand.u32 4294901760, %v241_v45  ;;  %v261_v59 = vsub.f32 %v7191_v31, %v7214_v46  ;;  %v5397_v26 = vld [vmem:[%s7864_s0 + $0x1] ss:$0 sm:$0xff]  ;;  %v5399_v28 = vld [vmem:[%s7864_s0 + $0x3] ss:$0 sm:$0xff] }
   0xe   :  { %v7209_v44 = vpack.c.bf16 %v169_v38, %v166_v35  ;;  %68 = vperm.xlu1 %7006, %v50_v37   ;;  %6461 = vmatprep.subr.bf16.mxu0 %v7201_v40  ;;  %v271_v48 = vand.u32 4294901760, %v7205_v42  ;;  %v7225_v51 = vsub.f32 %v132_v34, %v169_v38  ;;  %v7252_v2 = vand.u32 4294901760, %v251_v53  ;;  %v5400_v35 = vld [vmem:[%s7864_s0 + $0x4] ss:$0 sm:$0xff] }
   0xf   :  { %5796 = vmatprep.mubr.f32.mxu0 %v7203_v41  ;;  %v278_v49 = vand.u32 4294901760, %v7207_v43  ;;  %6463 = vmatpush3.bf16.msra.mxu0 %v7201_v40  ;;  %v285_v56 = vand.u32 4294901760, %v7223_v50  ;;  %v7258_v7 = vand.u32 4294901760, %v261_v59  ;;  %v6476_v10 = vpack.c.bf16 %v7207_v43, %v7205_v42 }
  0x10   :  { %5880 = vmatprep.mubr.f32.mxu1 %v7203_v41  ;;  %6465 = vmatprep.subr.bf16.mxu0 %v7209_v44  ;;  %v272_v54 = vsub.f32 %v7205_v42, %v271_v48  ;;  %v292_v57 = vand.u32 4294901760, %v7225_v51  ;;  %v6480_v12 = vpack.c.bf16 %v7225_v51, %v7223_v50 }
  0x11   :  { %v279_v55 = vsub.f32 %v7207_v43, %v278_v49  ;;  %87 = vperm.xlu0 %7005, %v73_v47   ;;  %v286_v63 = vsub.f32 %v7223_v50, %v285_v56  ;;  %v6492_v15 = vpack.c.bf16 %v278_v49, %v271_v48 }
  0x12   :  { %92 = vperm.xlu1 %7006, %v74_v52   ;;  %v273_v61 = vand.u32 4294901760, %v272_v54  ;;  %v293_v0 = vsub.f32 %v7225_v51, %v292_v57  ;;  %v6496_v16 = vpack.c.bf16 %v292_v57, %v285_v56  ;;  %v5401_v54 = vld [vmem:[%s7864_s0 + $0x5] ss:$0 sm:$0xff] }
  0x13   :  { %v280_v62 = vand.u32 4294901760, %v279_v55  ;;  %6467 = vmatpush3.bf16.msra.mxu0 %v7209_v44  ;;  %v287_v4 = vand.u32 4294901760, %v286_v63 }
  0x14   :  { %v294_v5 = vand.u32 4294901760, %v293_v0 }
  0x15   :  { %v6468_v3 = vpack.c.bf16 %v280_v62, %v273_v61  ;;  %101 = vperm.xlu0 %7005, %v95_v60  }
  0x16   :  { %106 = vperm.xlu1 %7006, %v96_v1   ;;  %5797 = vmatmul.mubr.f32.vlgmr.msra.gmra.mrb[0].mxu0 %v7239_v58  ;;  %v6472_v8 = vpack.c.bf16 %v294_v5, %v287_v4 }
  0x17   :  { %6469 = vmatprep.subr.bf16.mxu0 %v6468_v3  ;;  %5799 = vmatprep.mubr.f32.mxu0 %v7252_v2 }
  0x18   :  { %6471 = vmatpush3.bf16.msra.mxu0 %v6468_v3 }
  0x19   :  { %6473 = vmatprep.subr.bf16.mxu0 %v6472_v8  ;;  %111 = vperm.xlu0 %7005, %v97_v6  }
  0x1a   :  { %116 = vperm.xlu1 %7006, %v98_v9   ;;  %5800 = vmatmul.mubr.f32.gmra.mrb[2].mxu0 %v7258_v7 }
  0x1b   :  { %5810 = vmatprep.mubr.f32.mxu0 %v7153_v13 }
  0x1c   :  { %6475 = vmatpush3.bf16.msra.mxu0 %v6472_v8 }
  0x1d   :  { %6477 = vmatprep.subr.bf16.mxu0 %v6476_v10  ;;  %122 = vperm.xlu0 %7005, %v119_v11  }
  0x1f   :  { %5811 = vmatmul.mubr.f32.vlgmr.msra.gmra.mrb[0].mxu0 %v7155_v14 }
  0x20   :  { %6479 = vmatpush3.bf16.msra.mxu0 %v6476_v10  ;;  %5813 = vmatprep.mubr.f32.mxu0 %v7162_v18  ;;  %v5402_v10 = vld [vmem:[%s7864_s0 + $0x6] ss:$0 sm:$0xff] }
  0x21   :  { %6481 = vmatprep.subr.bf16.mxu0 %v6480_v12 }
  0x23   :  { %5814 = vmatmul.mubr.f32.gmra.mrb[2].mxu0 %v7164_v19 }
  0x24   :  { %6483 = vmatpush3.bf16.msra.mxu0 %v6480_v12  ;;  %5824 = vmatprep.mubr.f32.mxu0 %v7170_v21 }
  0x25   :  { %6485 = vmatprep.subr.bf16.mxu0 %v7201_v40 }
  0x27   :  { %5825 = vmatmul.mubr.f32.vlgmr.msra.gmra.mrb[0].mxu0 %v7173_v22 }
  0x28   :  { %6487 = vmatpush3.bf16.msra.mxu0 %v7201_v40  ;;  %5827 = vmatprep.mubr.f32.mxu0 %v7179_v24 }
  0x29   :  { %6489 = vmatprep.subr.bf16.mxu0 %v7209_v44 }
  0x2b   :  { %5828 = vmatmul.mubr.f32.gmra.mrb[2].mxu0 %v7191_v31 }
  0x2c   :  { %6491 = vmatpush3.bf16.msra.mxu0 %v7209_v44  ;;  %5838 = vmatprep.mubr.f32.mxu0 %v7182_v25 }
  0x2d   :  { %6493 = vmatprep.subr.bf16.mxu0 %v6492_v15 }
  0x2f   :  { %5839 = vmatmul.mubr.f32.vlgmr.msra.gmra.mrb[0].mxu0 %v7188_v30 }
  0x30   :  { %6495 = vmatpush3.bf16.msra.mxu0 %v6492_v15  ;;  %5841 = vmatprep.mubr.f32.mxu0 %v7199_v39 }
  0x31   :  { %6497 = vmatprep.subr.bf16.mxu0 %v6496_v16 }
  0x33   :  { %5842 = vmatmul.mubr.f32.gmra.mrb[2].mxu0 %v7214_v46 }
  0x34   :  { %6499 = vmatpush3.bf16.msra.mxu0 %v6496_v16  ;;  %5852 = vmatprep.mubr.f32.mxu0 %v7153_v13  ;;  %v5403_v16 = vld [vmem:[%s7864_s0 + $0x7] ss:$0 sm:$0xff] }
  0x35   :  { %6501 = vmatprep.subr.bf16.mxu0 %v7201_v40 }
  0x37   :  { %5853 = vmatmul.mubr.f32.vlgmr.msra.gmra.mrb[0].mxu0 %v7155_v14 }
  0x38   :  { %6503 = vmatpush3.bf16.msra.mxu0 %v7201_v40  ;;  %5855 = vmatprep.mubr.f32.mxu0 %v7162_v18 }
  0x39   :  { %6505 = vmatprep.subr.bf16.mxu0 %v7209_v44 }
  0x3b   :  { %5856 = vmatmul.mubr.f32.gmra.mrb[2].mxu0 %v7164_v19 }
  0x3c   :  { %6507 = vmatpush3.bf16.msra.mxu0 %v7209_v44  ;;  %5866 = vmatprep.mubr.f32.mxu0 %v7153_v13 }
  0x3f   :  { %5867 = vmatmul.mubr.f32.vlgmr.msra.gmra.mrb[0].mxu0 %v7155_v14 }
  0x40   :  { %5869 = vmatprep.mubr.f32.mxu0 %v7162_v18 }
  0x43   :  { %5870 = vmatmul.mubr.f32.gmra.mrb[2].mxu0 %v7164_v19 }
  0x44   :  { %5964 = vmatprep.mubr.f32.mxu0 %v7203_v41 }
  0x84   :  { %v7298_v17 = vpop.permute.xlu0 %53 }
  0x85   :  { %v7300_v20 = vpop.permute.xlu1 %77  ;;  %v807_v33 = vmul.f32 %v5397_v26, %v7298_v17  ;;  %v1461_v36 = vmul.f32 %v5398_v27, %v7298_v17  ;;  %v2115_v38 = vmul.f32 %v5399_v28, %v7298_v17  ;;  %v2769_v60 = vmul.f32 %v5400_v35, %v7298_v17 }
  0x86   :  { %v3423_v1 = vmul.f32 %v5401_v54, %v7298_v17 }
  0x87   :  { %v7328_v42 = vadd.f32 %v807_v33, %v7300_v20  ;;  %v7334_v45 = vadd.f32 %v1461_v36, %v7300_v20  ;;  %v7340_v48 = vadd.f32 %v2115_v38, %v7300_v20 }
  0x88   :  { %v7302_v23 = vpop.permute.xlu0 %58  ;;  %v7381_v33 = vadd.f32 %v3423_v1, %v7300_v20 }
  0x89   :  { %v7313_v29 = vpop.permute.xlu1 %82  ;;  %v808_v32 = vmul.f32 %v5397_v26, %v7302_v23  ;;  %v1462_v34 = vmul.f32 %v5398_v27, %v7302_v23  ;;  %v2116_v37 = vmul.f32 %v5399_v28, %v7302_v23  ;;  %v2770_v49 = vmul.f32 %v5400_v35, %v7302_v23 }
  0x8a   :  { %v3424_v0 = vmul.f32 %v5401_v54, %v7302_v23  ;;  %7868 = vst [vmem:[#allocation5_spill] sm:$0xff] %v7381_v33  ;;  %v4078_v36 = vmul.f32 %v5402_v10, %v7302_v23 }
  0x8b   :  { %v7325_v40 = vadd.f32 %v808_v32, %v7313_v29  ;;  %v7331_v43 = vadd.f32 %v1462_v34, %v7313_v29  ;;  %v7337_v47 = vadd.f32 %v2116_v37, %v7313_v29  ;;  %v7347_v59 = vadd.f32 %v2770_v49, %v7313_v29 }
  0x8c   :  { %v64_v44 = vpop.permute.xlu0 %63  ;;  %v7378_v32 = vadd.f32 %v3424_v0, %v7313_v29  ;;  %v4077_v37 = vmul.f32 %v5402_v10, %v7298_v17 }
  0x8d   :  { %v69_v50 = vpop.permute.xlu1 %68  ;;  %v809_v51 = vmul.f32 %v5397_v26, %v64_v44  ;;  %v1463_v52 = vmul.f32 %v5398_v27, %v64_v44  ;;  %v2117_v53 = vmul.f32 %v5399_v28, %v64_v44  ;;  %v2771_v62 = vmul.f32 %v5400_v35, %v64_v44 }
  0x8e   :  { %v810_v55 = vmul.f32 %v5397_v26, %v69_v50  ;;  %v1464_v56 = vmul.f32 %v5398_v27, %v69_v50  ;;  %v2118_v57 = vmul.f32 %v5399_v28, %v69_v50  ;;  %v2772_v61 = vmul.f32 %v5400_v35, %v69_v50  ;;  %7867 = vst [vmem:[#allocation4_spill] sm:$0xff] %v7378_v32 }
  0x8f   :  { %v3426_v3 = vmul.f32 %v5401_v54, %v69_v50  ;;  %v3425_v4 = vmul.f32 %v5401_v54, %v64_v44  ;;  %v7371_v26 = vadd.f32 %v2769_v60, %v7300_v20  ;;  %v4080_v38 = vmul.f32 %v5402_v10, %v69_v50 }
  0x90   :  { %v88_v63 = vpop.permute.xlu0 %87  ;;  %v4079_v49 = vmul.f32 %v5402_v10, %v64_v44  ;;  %v4734_v54 = vmul.f32 %v5403_v16, %v69_v50  ;;  %v125_v32 = vlaneseq }
  0x91   :  { %v93_v5 = vpop.permute.xlu1 %92  ;;  %v7352_v6 = vadd.f32 %v809_v51, %v88_v63  ;;  %v7354_v8 = vadd.f32 %v1463_v52, %v88_v63  ;;  %v7356_v9 = vadd.f32 %v2117_v53, %v88_v63  ;;  %v7375_v28 = vadd.f32 %v2771_v62, %v88_v63 }
  0x92   :  { %v7361_v11 = vadd.f32 %v810_v55, %v93_v5  ;;  %v7363_v12 = vadd.f32 %v1464_v56, %v93_v5  ;;  %v7365_v15 = vadd.f32 %v2118_v57, %v93_v5  ;;  %v7373_v27 = vadd.f32 %v2772_v61, %v93_v5 }
  0x93   :  { %v7383_v34 = vadd.f32 %v3426_v3, %v93_v5  ;;  %v7385_v35 = vadd.f32 %v3425_v4, %v88_v63  ;;  %v4732_v51 = vmul.f32 %v5403_v16, %v7302_v23  ;;  %v7391_v52 = vadd.f32 %v4078_v36, %v7313_v29  ;;  %v5396_v3 = vld [vmem:[%s7864_s0] ss:$0 sm:$0xff] }
  0x94   :  { %v4731_v53 = vmul.f32 %v5403_v16, %v7298_v17  ;;  %v4733_v55 = vmul.f32 %v5403_v16, %v64_v44  ;;  %v7395_v56 = vadd.f32 %v4077_v37, %v7300_v20  ;;  %v7397_v57 = vadd.f32 %v4080_v38, %v93_v5 }
  0x95   :  { %7869 = vst [vmem:[#allocation6_spill] sm:$0xff] %v7383_v34  ;;  %7870 = vst [vmem:[#allocation7_spill] sm:$0xff] %v7385_v35  ;;  %v7399_v60 = vadd.f32 %v4079_v49, %v88_v63  ;;  %v7402_v61 = vadd.f32 %v4732_v51, %v7313_v29  ;;  %v7407_v0 = vadd.f32 %v4734_v54, %v93_v5 }
  0x96   :  { %7871 = vst [vmem:[#allocation8_spill] sm:$0xff] %v7391_v52  ;;  %7872 = vst [vmem:[#allocation9_spill] sm:$0xff] %v7395_v56  ;;  %v7405_v62 = vadd.f32 %v4731_v53, %v7300_v20  ;;  %v7409_v1 = vadd.f32 %v4733_v55, %v88_v63  ;;  %v139_v4 = vmul.f32 %v5396_v3, %v7302_v23 }
  0x97   :  { %7873 = vst [vmem:[#allocation10_spill] sm:$0xff] %v7397_v57  ;;  %7874 = vst [vmem:[#allocation11_spill] sm:$0xff] %v7399_v60  ;;  %v138_v10 = vmul.f32 %v5396_v3, %v7298_v17  ;;  %v141_v36 = vmul.f32 %v5396_v3, %v69_v50  ;;  %v140_v49 = vmul.f32 %v5396_v3, %v64_v44  ;;  %v7418_v17 = vpop.permute.xlu1 %106 }
  0x98   :  { %7875 = vst [vmem:[#allocation12_spill] sm:$0xff] %v7402_v61  ;;  %7876 = vst [vmem:[#allocation13_spill] sm:$0xff] %v7405_v62  ;;  %v143_v16 = vadd.f32 %v139_v4, %v7313_v29  ;;  %v7420_v29 = vpop.permute.xlu0 %101 }
  0x99   :  { %7877 = vst [vmem:[#allocation14_spill] sm:$0xff] %v7407_v0  ;;  %7878 = vst [vmem:[#allocation15_spill] sm:$0xff] %v7409_v1  ;;  %v142_v38 = vadd.f32 %v138_v10, %v7300_v20  ;;  %v145_v55 = vadd.f32 %v141_v36, %v93_v5  ;;  %v144_v0 = vadd.f32 %v140_v49, %v88_v63 }
 0x112   :  { %v5868_v37 = vpop.f32.mrb[0].mxu0 }
 0x113   :  { %v774_v51 = vadd.f32 %v5868_v37, %v143_v16  ;;  %v751_v53 = vpop.f32.mrb[1].mxu0  ;;  %v7425_v16 = vpop.permute.xlu1 %116 }
 0x114   :  { %v773_v54 = vadd.f32 %v751_v53, %v142_v38  ;;  %v7430_v37 = vpop.permute.xlu0 %111 }
 0x115   :  { %7007 = vtanh.f32 %v774_v51 }
 0x116   :  { %7009 = vtanh.f32 %v773_v54  ;;  %v5871_v1 = vpop.f32.mrb[2].mxu0 }
 0x117   :  { %v776_v62 = vadd.f32 %v5871_v1, %v145_v55  ;;  %v763_v61 = vpop.f32.mrb[3].mxu0 }
 0x118   :  { %v775_v23 = vadd.f32 %v763_v61, %v144_v0 }
 0x119   :  { %7011 = vtanh.f32 %v776_v62 }
 0x11a   :  { %7013 = vtanh.f32 %v775_v23 }
 0x11f   :  { %v7008_v50 = vpop.eup %7007 }
 0x120   :  { %v7010_v20 = vpop.eup %7009  ;;  %v782_v44 = vmul.f32 %v7008_v50, %v7418_v17  ;;  %v819_v3 = vand.u32 4294901760, %v7008_v50 }
 0x121   :  { %v781_v4 = vmul.f32 %v7010_v20, %v7420_v29  ;;  %v816_v5 = vand.u32 4294901760, %v7010_v20 }
 0x122   :  { %v787_v10 = vsel %vm38_vm0, %v782_v44, 0.0  ;;  %v933_v63 = vsub.f32 %v7008_v50, %v819_v3 }
 0x123   :  { %v7012_v1 = vpop.eup %7011  ;;  %v786_v61 = vsel %vm38_vm0, %v781_v4, 0.0  ;;  %v7428_v62 = vpack.c.bf16 %v819_v3, %v816_v5  ;;  %v926_v0 = vsub.f32 %v7010_v20, %v816_v5 }
 0x124   :  { %v7014_v36 = vpop.eup %7013  ;;  %v788_v38 = vadd.f32 %v787_v10, %v786_v61  ;;  %v784_v49 = vmul.f32 %v7012_v1, %v7425_v16  ;;  %v825_v51 = vand.u32 4294901760, %v7012_v1  ;;  %v934_v53 = vand.u32 4294901760, %v933_v63 }
 0x125   :  { %v783_v54 = vmul.f32 %v7014_v36, %v7430_v37  ;;  %6509 = vmatprep.subr.bf16.mxu1 %v7428_v62  ;;  %v822_v55 = vand.u32 4294901760, %v7014_v36  ;;  %v927_v23 = vand.u32 4294901760, %v926_v0  ;;  %v6524_v50 = vpack.c.bf16 %v933_v63, %v926_v0 }
 0x126   :  { %6511 = vmatpush3.bf16.msra.mxu1 %v7428_v62  ;;  %v935_v44 = vsub.f32 %v933_v63, %v934_v53  ;;  %v947_v3 = vsub.f32 %v7012_v1, %v825_v51  ;;  %v791_v52 = vsel %vm38_vm0, %v784_v49, 0.0  ;;  %v126_v49 = vshrl.u32 %v125_v32, 7 }
 0x127   :  { %v789_v20 = vsel %vm38_vm0, %v783_v54, 0.0  ;;  %v7437_v4 = vpack.c.bf16 %v825_v51, %v822_v55  ;;  %v928_v5 = vsub.f32 %v926_v0, %v927_v23  ;;  %v940_v10 = vsub.f32 %v7014_v36, %v822_v55 }
 0x128   :  { %v790_v61 = vadd.f32 %v789_v20, %v788_v38  ;;  %v936_v60 = vand.u32 4294901760, %v935_v44  ;;  %v948_v57 = vand.u32 4294901760, %v947_v3  ;;  %v6540_v56 = vpack.c.bf16 %v934_v53, %v927_v23 }
 0x129   :  { %6513 = vmatprep.subr.bf16.mxu1 %v7437_v4  ;;  %v929_v35 = vand.u32 4294901760, %v928_v5  ;;  %v941_v34 = vand.u32 4294901760, %v940_v10  ;;  %v6528_v33 = vpack.c.bf16 %v947_v3, %v940_v10 }
 0x12a   :  { %v792_v63 = vadd.f32 %v791_v52, %v790_v61  ;;  %6515 = vmatpush3.bf16.msra.mxu1 %v7437_v4  ;;  %v949_v1 = vsub.f32 %v947_v3, %v948_v57  ;;  %v127_v52 = vsub.s32 0, %v126_v49 }
 0x12b   :  { %v6516_v51 = vpack.c.bf16 %v936_v60, %v929_v35  ;;  %v942_v54 = vsub.f32 %v940_v10, %v941_v34  ;;  %v6544_v0 = vpack.c.bf16 %v948_v57, %v941_v34  ;;  %v123_v34 = vpop.permute.xlu0 %122 }
 0x12c   :  { %v793_v36 = vrot.slane %v792_v63, 4  ;;  %v950_v38 = vand.u32 4294901760, %v949_v1  ;;  %v7447_v32 = vrot.slane %v123_v34, %v127_v52 }
 0x12d   :  { %5881 = vmatmul.mubr.f32.vlgmr.msra.gmra.mrb[0].mxu1 %v7239_v58  ;;  %6517 = vmatprep.subr.bf16.mxu1 %v6516_v51  ;;  %v943_v53 = vand.u32 4294901760, %v942_v54 }
 0x12e   :  { %v794_v55 = vadd.f32 %v793_v36, %v792_v63  ;;  %6519 = vmatpush3.bf16.msra.mxu1 %v6516_v51  ;;  %5883 = vmatprep.mubr.f32.mxu1 %v7252_v2 }
 0x12f   :  { %v6520_v23 = vpack.c.bf16 %v950_v38, %v943_v53 }
 0x130   :  { %v795_v44 = vrot.slane %v794_v55, 2 }
 0x131   :  { %5884 = vmatmul.mubr.f32.gmra.mrb[2].mxu1 %v7258_v7  ;;  %6521 = vmatprep.subr.bf16.mxu1 %v6520_v23 }
 0x132   :  { %v796_v35 = vadd.f32 %v795_v44, %v794_v55  ;;  %6523 = vmatpush3.bf16.msra.mxu1 %v6520_v23  ;;  %5894 = vmatprep.mubr.f32.mxu1 %v7153_v13 }
 0x133   :  { %6525 = vmatprep.subr.bf16.mxu1 %v6524_v50 }
 0x134   :  { %v797_v57 = vrot.slane %v796_v35, 1 }
 0x135   :  { %5895 = vmatmul.mubr.f32.vlgmr.msra.gmra.mrb[0].mxu1 %v7155_v14 }
 0x136   :  { %v798_v60 = vadd.f32 %v797_v57, %v796_v35  ;;  %6527 = vmatpush3.bf16.msra.mxu1 %v6524_v50  ;;  %5897 = vmatprep.mubr.f32.mxu1 %v7162_v18 }
 0x137   :  { %6529 = vmatprep.subr.bf16.mxu1 %v6528_v33 }
 0x138   :  { %v799_v3 = vadd.f32 %v798_v60, %v7447_v32 }
 0x139   :  { %5898 = vmatmul.mubr.f32.gmra.mrb[2].mxu1 %v7164_v19 }
 0x13a   :  { %801 = vst.msk [vmem:[%s7865_s7] sm:$0x1] %vm800_vm2, %v799_v3  ;;  %6531 = vmatpush3.bf16.msra.mxu1 %v6528_v33  ;;  %5908 = vmatprep.mubr.f32.mxu1 %v7170_v21 }
 0x13b   :  { %6533 = vmatprep.subr.bf16.mxu1 %v7428_v62 }
 0x13d   :  { %5909 = vmatmul.mubr.f32.vlgmr.msra.gmra.mrb[0].mxu1 %v7173_v22 }
 0x13e   :  { %6535 = vmatpush3.bf16.msra.mxu1 %v7428_v62  ;;  %5911 = vmatprep.mubr.f32.mxu1 %v7179_v24 }
 0x13f   :  { %6537 = vmatprep.subr.bf16.mxu1 %v7437_v4 }
 0x141   :  { %5912 = vmatmul.mubr.f32.gmra.mrb[2].mxu1 %v7191_v31 }
 0x142   :  { %6539 = vmatpush3.bf16.msra.mxu1 %v7437_v4  ;;  %5922 = vmatprep.mubr.f32.mxu1 %v7182_v25 }
 0x143   :  { %6541 = vmatprep.subr.bf16.mxu1 %v6540_v56 }
 0x145   :  { %5923 = vmatmul.mubr.f32.vlgmr.msra.gmra.mrb[0].mxu1 %v7188_v30 }
 0x146   :  { %6543 = vmatpush3.bf16.msra.mxu1 %v6540_v56  ;;  %5925 = vmatprep.mubr.f32.mxu1 %v7199_v39 }
 0x147   :  { %6545 = vmatprep.subr.bf16.mxu1 %v6544_v0 }
 0x149   :  { %5926 = vmatmul.mubr.f32.gmra.mrb[2].mxu1 %v7214_v46 }
 0x14a   :  { %6547 = vmatpush3.bf16.msra.mxu1 %v6544_v0  ;;  %5936 = vmatprep.mubr.f32.mxu1 %v7153_v13 }
 0x14b   :  { %6549 = vmatprep.subr.bf16.mxu1 %v7428_v62 }
 0x14d   :  { %5937 = vmatmul.mubr.f32.vlgmr.msra.gmra.mrb[0].mxu1 %v7155_v14 }
 0x14e   :  { %6551 = vmatpush3.bf16.msra.mxu1 %v7428_v62  ;;  %5939 = vmatprep.mubr.f32.mxu1 %v7162_v18 }
 0x14f   :  { %6553 = vmatprep.subr.bf16.mxu1 %v7437_v4 }
 0x151   :  { %5940 = vmatmul.mubr.f32.gmra.mrb[2].mxu1 %v7164_v19 }
 0x152   :  { %6555 = vmatpush3.bf16.msra.mxu1 %v7437_v4  ;;  %5950 = vmatprep.mubr.f32.mxu1 %v7153_v13 }
 0x155   :  { %5951 = vmatmul.mubr.f32.vlgmr.msra.gmra.mrb[0].mxu1 %v7155_v14 }
 0x156   :  { %5953 = vmatprep.mubr.f32.mxu1 %v7162_v18 }
 0x159   :  { %5954 = vmatmul.mubr.f32.gmra.mrb[2].mxu1 %v7164_v19 }
 0x15a   :  { %6048 = vmatprep.mubr.f32.mxu1 %v7203_v41 }
 0x228   :  { %v5952_v33 = vpop.f32.mrb[0].mxu1 }
 0x229   :  { %v1430_v56 = vadd.f32 %v5952_v33, %v7325_v40  ;;  %v1407_v62 = vpop.f32.mrb[1].mxu1 }
 0x22a   :  { %v1429_v50 = vadd.f32 %v1407_v62, %v7328_v42 }
 0x22b   :  { %7015 = vtanh.f32 %v1430_v56 }
 0x22c   :  { %7017 = vtanh.f32 %v1429_v50  ;;  %v5955_v20 = vpop.f32.mrb[2].mxu1 }
 0x22d   :  { %v1432_v4 = vadd.f32 %v5955_v20, %v7361_v11  ;;  %v1419_v5 = vpop.f32.mrb[3].mxu1 }
 0x22e   :  { %v1431_v10 = vadd.f32 %v1419_v5, %v7352_v6 }
 0x22f   :  { %7019 = vtanh.f32 %v1432_v4 }
 0x230   :  { %7021 = vtanh.f32 %v1431_v10 }
 0x235   :  { %v7016_v61 = vpop.eup %7015 }
 0x236   :  { %v7018_v63 = vpop.eup %7017  ;;  %v1438_v1 = vmul.f32 %v7016_v61, %v7418_v17  ;;  %v1473_v51 = vand.u32 4294901760, %v7016_v61 }
 0x237   :  { %v1437_v40 = vmul.f32 %v7018_v63, %v7420_v29  ;;  %v1470_v54 = vand.u32 4294901760, %v7018_v63 }
 0x238   :  { %v1442_v42 = vsel %vm38_vm0, %v1438_v1, 0.0  ;;  %v1587_v0 = vsub.f32 %v7016_v61, %v1473_v51 }
 0x239   :  { %v7020_v36 = vpop.eup %7019  ;;  %v1441_v38 = vsel %vm38_vm0, %v1437_v40, 0.0  ;;  %v7489_v11 = vpack.c.bf16 %v1473_v51, %v1470_v54  ;;  %v1580_v53 = vsub.f32 %v7018_v63, %v1470_v54 }
 0x23a   :  { %v7022_v6 = vpop.eup %7021  ;;  %v1443_v49 = vadd.f32 %v1442_v42, %v1441_v38  ;;  %v1440_v55 = vmul.f32 %v7020_v36, %v7425_v16  ;;  %v1479_v23 = vand.u32 4294901760, %v7020_v36  ;;  %v1588_v44 = vand.u32 4294901760, %v1587_v0 }
 0x23b   :  { %v1439_v52 = vmul.f32 %v7022_v6, %v7430_v37  ;;  %6557 = vmatprep.subr.bf16.mxu0 %v7489_v11  ;;  %v1476_v35 = vand.u32 4294901760, %v7022_v6  ;;  %v1581_v34 = vand.u32 4294901760, %v1580_v53  ;;  %v6572_v57 = vpack.c.bf16 %v1587_v0, %v1580_v53 }
 0x23c   :  { %6559 = vmatpush3.bf16.msra.mxu0 %v7489_v11  ;;  %v1589_v60 = vsub.f32 %v1587_v0, %v1588_v44  ;;  %v1601_v3 = vsub.f32 %v7020_v36, %v1479_v23  ;;  %v1446_v61 = vsel %vm38_vm0, %v1440_v55, 0.0 }
 0x23d   :  { %v1444_v33 = vsel %vm38_vm0, %v1439_v52, 0.0  ;;  %v7496_v56 = vpack.c.bf16 %v1479_v23, %v1476_v35  ;;  %v1582_v62 = vsub.f32 %v1580_v53, %v1581_v34  ;;  %v1594_v50 = vsub.f32 %v7022_v6, %v1476_v35 }
 0x23e   :  { %v1445_v20 = vadd.f32 %v1444_v33, %v1443_v49  ;;  %v1590_v4 = vand.u32 4294901760, %v1589_v60  ;;  %v1602_v5 = vand.u32 4294901760, %v1601_v3  ;;  %v6588_v10 = vpack.c.bf16 %v1588_v44, %v1581_v34 }
 0x23f   :  { %6561 = vmatprep.subr.bf16.mxu0 %v7496_v56  ;;  %v1583_v63 = vand.u32 4294901760, %v1582_v62  ;;  %v1595_v1 = vand.u32 4294901760, %v1594_v50  ;;  %v6576_v51 = vpack.c.bf16 %v1601_v3, %v1594_v50 }
 0x240   :  { %v1447_v40 = vadd.f32 %v1446_v61, %v1445_v20  ;;  %6563 = vmatpush3.bf16.msra.mxu0 %v7496_v56  ;;  %v1603_v54 = vsub.f32 %v1601_v3, %v1602_v5 }
 0x241   :  { %v6564_v42 = vpack.c.bf16 %v1590_v4, %v1583_v63  ;;  %v1596_v0 = vsub.f32 %v1594_v50, %v1595_v1  ;;  %v6592_v36 = vpack.c.bf16 %v1602_v5, %v1595_v1 }
 0x242   :  { %v1448_v38 = vrot.slane %v1447_v40, 4  ;;  %v1604_v53 = vand.u32 4294901760, %v1603_v54 }
 0x243   :  { %5965 = vmatmul.mubr.f32.vlgmr.msra.gmra.mrb[4].mxu0 %v7239_v58  ;;  %6565 = vmatprep.subr.bf16.mxu0 %v6564_v42  ;;  %v1597_v6 = vand.u32 4294901760, %v1596_v0 }
 0x244   :  { %v1449_v49 = vadd.f32 %v1448_v38, %v1447_v40  ;;  %6567 = vmatpush3.bf16.msra.mxu0 %v6564_v42  ;;  %5967 = vmatprep.mubr.f32.mxu0 %v7252_v2 }
 0x245   :  { %v6568_v55 = vpack.c.bf16 %v1604_v53, %v1597_v6 }
 0x246   :  { %v1450_v23 = vrot.slane %v1449_v49, 2 }
 0x247   :  { %5968 = vmatmul.mubr.f32.gmra.mrb[6].mxu0 %v7258_v7  ;;  %6569 = vmatprep.subr.bf16.mxu0 %v6568_v55 }
 0x248   :  { %v1451_v44 = vadd.f32 %v1450_v23, %v1449_v49  ;;  %6571 = vmatpush3.bf16.msra.mxu0 %v6568_v55  ;;  %5978 = vmatprep.mubr.f32.mxu0 %v7153_v13 }
 0x249   :  { %6573 = vmatprep.subr.bf16.mxu0 %v6572_v57 }
 0x24a   :  { %v1452_v52 = vrot.slane %v1451_v44, 1 }
 0x24b   :  { %5979 = vmatmul.mubr.f32.vlgmr.msra.gmra.mrb[4].mxu0 %v7155_v14 }
 0x24c   :  { %v1453_v35 = vadd.f32 %v1452_v52, %v1451_v44  ;;  %6575 = vmatpush3.bf16.msra.mxu0 %v6572_v57  ;;  %5981 = vmatprep.mubr.f32.mxu0 %v7162_v18 }
 0x24d   :  { %6577 = vmatprep.subr.bf16.mxu0 %v6576_v51 }
 0x24e   :  { %v1454_v34 = vadd.f32 %v1453_v35, %v7447_v32 }
 0x24f   :  { %5982 = vmatmul.mubr.f32.gmra.mrb[6].mxu0 %v7164_v19 }
 0x250   :  { %1455 = vst.msk [vmem:[%s7865_s7 + $0x1] sm:$0x1] %vm800_vm2, %v1454_v34  ;;  %6579 = vmatpush3.bf16.msra.mxu0 %v6576_v51  ;;  %5992 = vmatprep.mubr.f32.mxu0 %v7170_v21 }
 0x251   :  { %6581 = vmatprep.subr.bf16.mxu0 %v7489_v11 }
 0x253   :  { %5993 = vmatmul.mubr.f32.vlgmr.msra.gmra.mrb[4].mxu0 %v7173_v22 }
 0x254   :  { %6583 = vmatpush3.bf16.msra.mxu0 %v7489_v11  ;;  %5995 = vmatprep.mubr.f32.mxu0 %v7179_v24 }
 0x255   :  { %6585 = vmatprep.subr.bf16.mxu0 %v7496_v56 }
 0x257   :  { %5996 = vmatmul.mubr.f32.gmra.mrb[6].mxu0 %v7191_v31 }
 0x258   :  { %6587 = vmatpush3.bf16.msra.mxu0 %v7496_v56  ;;  %6006 = vmatprep.mubr.f32.mxu0 %v7182_v25 }
 0x259   :  { %6589 = vmatprep.subr.bf16.mxu0 %v6588_v10 }
 0x25b   :  { %6007 = vmatmul.mubr.f32.vlgmr.msra.gmra.mrb[4].mxu0 %v7188_v30 }
 0x25c   :  { %6591 = vmatpush3.bf16.msra.mxu0 %v6588_v10  ;;  %6009 = vmatprep.mubr.f32.mxu0 %v7199_v39 }
 0x25d   :  { %6593 = vmatprep.subr.bf16.mxu0 %v6592_v36 }
 0x25f   :  { %6010 = vmatmul.mubr.f32.gmra.mrb[6].mxu0 %v7214_v46 }
 0x260   :  { %6595 = vmatpush3.bf16.msra.mxu0 %v6592_v36  ;;  %6020 = vmatprep.mubr.f32.mxu0 %v7153_v13 }
 0x261   :  { %6597 = vmatprep.subr.bf16.mxu0 %v7489_v11 }
 0x263   :  { %6021 = vmatmul.mubr.f32.vlgmr.msra.gmra.mrb[4].mxu0 %v7155_v14 }
 0x264   :  { %6599 = vmatpush3.bf16.msra.mxu0 %v7489_v11  ;;  %6023 = vmatprep.mubr.f32.mxu0 %v7162_v18 }
 0x265   :  { %6601 = vmatprep.subr.bf16.mxu0 %v7496_v56 }
 0x267   :  { %6024 = vmatmul.mubr.f32.gmra.mrb[6].mxu0 %v7164_v19 }
 0x268   :  { %6603 = vmatpush3.bf16.msra.mxu0 %v7496_v56  ;;  %6034 = vmatprep.mubr.f32.mxu0 %v7153_v13 }
 0x26b   :  { %6035 = vmatmul.mubr.f32.vlgmr.msra.gmra.mrb[4].mxu0 %v7155_v14 }
 0x26c   :  { %6037 = vmatprep.mubr.f32.mxu0 %v7162_v18 }
 0x26f   :  { %6038 = vmatmul.mubr.f32.gmra.mrb[6].mxu0 %v7164_v19 }
 0x270   :  { %6132 = vmatprep.mubr.f32.mxu0 %v7203_v41 }
 0x33e   :  { %v6036_v57 = vpop.f32.mrb[4].mxu0 }
 0x33f   :  { %v2084_v11 = vadd.f32 %v6036_v57, %v7331_v43  ;;  %v2061_v60 = vpop.f32.mrb[5].mxu0 }
 0x340   :  { %v2083_v3 = vadd.f32 %v2061_v60, %v7334_v45 }
 0x341   :  { %7023 = vtanh.f32 %v2084_v11 }
 0x342   :  { %7025 = vtanh.f32 %v2083_v3  ;;  %v6039_v33 = vpop.f32.mrb[6].mxu0 }
 0x343   :  { %v2086_v56 = vadd.f32 %v6039_v33, %v7363_v12  ;;  %v2073_v62 = vpop.f32.mrb[7].mxu0 }
 0x344   :  { %v2085_v50 = vadd.f32 %v2073_v62, %v7354_v8 }
 0x345   :  { %7027 = vtanh.f32 %v2086_v56 }
 0x346   :  { %7029 = vtanh.f32 %v2085_v50 }
 0x34b   :  { %v7024_v20 = vpop.eup %7023 }
 0x34c   :  { %v7026_v4 = vpop.eup %7025  ;;  %v2092_v5 = vmul.f32 %v7024_v20, %v7418_v17  ;;  %v2127_v10 = vand.u32 4294901760, %v7024_v20 }
 0x34d   :  { %v2091_v43 = vmul.f32 %v7026_v4, %v7420_v29  ;;  %v2124_v61 = vand.u32 4294901760, %v7026_v4 }
 0x34e   :  { %v2096_v45 = vsel %vm38_vm0, %v2092_v5, 0.0  ;;  %v2241_v63 = vsub.f32 %v7024_v20, %v2127_v10 }
 0x34f   :  { %v7028_v1 = vpop.eup %7027  ;;  %v2095_v51 = vsel %vm38_vm0, %v2091_v43, 0.0  ;;  %v7546_v12 = vpack.c.bf16 %v2127_v10, %v2124_v61  ;;  %v2234_v40 = vsub.f32 %v7026_v4, %v2124_v61 }
 0x350   :  { %v7030_v8 = vpop.eup %7029  ;;  %v2097_v54 = vadd.f32 %v2096_v45, %v2095_v51  ;;  %v2094_v42 = vmul.f32 %v7028_v1, %v7425_v16  ;;  %v2133_v0 = vand.u32 4294901760, %v7028_v1  ;;  %v2242_v36 = vand.u32 4294901760, %v2241_v63 }
 0x351   :  { %v2093_v38 = vmul.f32 %v7030_v8, %v7430_v37  ;;  %6605 = vmatprep.subr.bf16.mxu1 %v7546_v12  ;;  %v2130_v53 = vand.u32 4294901760, %v7030_v8  ;;  %v2235_v6 = vand.u32 4294901760, %v2234_v40  ;;  %v6620_v49 = vpack.c.bf16 %v2241_v63, %v2234_v40 }
 0x352   :  { %6607 = vmatpush3.bf16.msra.mxu1 %v7546_v12  ;;  %v2243_v55 = vsub.f32 %v2241_v63, %v2242_v36  ;;  %v2255_v23 = vsub.f32 %v7028_v1, %v2133_v0  ;;  %v2100_v33 = vsel %vm38_vm0, %v2094_v42, 0.0 }
 0x353   :  { %v2098_v44 = vsel %vm38_vm0, %v2093_v38, 0.0  ;;  %v7553_v52 = vpack.c.bf16 %v2133_v0, %v2130_v53  ;;  %v2236_v35 = vsub.f32 %v2234_v40, %v2235_v6  ;;  %v2248_v34 = vsub.f32 %v7030_v8, %v2130_v53 }
 0x354   :  { %v2099_v57 = vadd.f32 %v2098_v44, %v2097_v54  ;;  %v2244_v11 = vand.u32 4294901760, %v2243_v55  ;;  %v2256_v60 = vand.u32 4294901760, %v2255_v23  ;;  %v6636_v3 = vpack.c.bf16 %v2242_v36, %v2235_v6 }
 0x355   :  { %6609 = vmatprep.subr.bf16.mxu1 %v7553_v52  ;;  %v2237_v56 = vand.u32 4294901760, %v2236_v35  ;;  %v2249_v62 = vand.u32 4294901760, %v2248_v34  ;;  %v6624_v50 = vpack.c.bf16 %v2255_v23, %v2248_v34 }
 0x356   :  { %v2101_v20 = vadd.f32 %v2100_v33, %v2099_v57  ;;  %6611 = vmatpush3.bf16.msra.mxu1 %v7553_v52  ;;  %v2257_v4 = vsub.f32 %v2255_v23, %v2256_v60 }
 0x357   :  { %v6612_v5 = vpack.c.bf16 %v2244_v11, %v2237_v56  ;;  %v2250_v10 = vsub.f32 %v2248_v34, %v2249_v62  ;;  %v6640_v43 = vpack.c.bf16 %v2256_v60, %v2249_v62 }
 0x358   :  { %v2102_v61 = vrot.slane %v2101_v20, 4  ;;  %v2258_v45 = vand.u32 4294901760, %v2257_v4 }
 0x359   :  { %6049 = vmatmul.mubr.f32.vlgmr.msra.gmra.mrb[4].mxu1 %v7239_v58  ;;  %6613 = vmatprep.subr.bf16.mxu1 %v6612_v5  ;;  %v2251_v63 = vand.u32 4294901760, %v2250_v10 }
 0x35a   :  { %v2103_v1 = vadd.f32 %v2102_v61, %v2101_v20  ;;  %6615 = vmatpush3.bf16.msra.mxu1 %v6612_v5  ;;  %6051 = vmatprep.mubr.f32.mxu1 %v7252_v2 }
 0x35b   :  { %v6616_v51 = vpack.c.bf16 %v2258_v45, %v2251_v63 }
 0x35c   :  { %v2104_v40 = vrot.slane %v2103_v1, 2 }
 0x35d   :  { %6052 = vmatmul.mubr.f32.gmra.mrb[6].mxu1 %v7258_v7  ;;  %6617 = vmatprep.subr.bf16.mxu1 %v6616_v51 }
 0x35e   :  { %v2105_v8 = vadd.f32 %v2104_v40, %v2103_v1  ;;  %6619 = vmatpush3.bf16.msra.mxu1 %v6616_v51  ;;  %6062 = vmatprep.mubr.f32.mxu1 %v7153_v13 }
 0x35f   :  { %6621 = vmatprep.subr.bf16.mxu1 %v6620_v49 }
 0x360   :  { %v2106_v54 = vrot.slane %v2105_v8, 1 }
 0x361   :  { %6063 = vmatmul.mubr.f32.vlgmr.msra.gmra.mrb[4].mxu1 %v7155_v14 }
 0x362   :  { %v2107_v42 = vadd.f32 %v2106_v54, %v2105_v8  ;;  %6623 = vmatpush3.bf16.msra.mxu1 %v6620_v49  ;;  %6065 = vmatprep.mubr.f32.mxu1 %v7162_v18 }
 0x363   :  { %6625 = vmatprep.subr.bf16.mxu1 %v6624_v50 }
 0x364   :  { %v2108_v0 = vadd.f32 %v2107_v42, %v7447_v32 }
 0x365   :  { %6066 = vmatmul.mubr.f32.gmra.mrb[6].mxu1 %v7164_v19 }
 0x366   :  { %2109 = vst.msk [vmem:[%s7865_s7 + $0x2] sm:$0x1] %vm800_vm2, %v2108_v0  ;;  %6627 = vmatpush3.bf16.msra.mxu1 %v6624_v50  ;;  %6076 = vmatprep.mubr.f32.mxu1 %v7170_v21 }
 0x367   :  { %6629 = vmatprep.subr.bf16.mxu1 %v7546_v12 }
 0x369   :  { %6077 = vmatmul.mubr.f32.vlgmr.msra.gmra.mrb[4].mxu1 %v7173_v22 }
 0x36a   :  { %6631 = vmatpush3.bf16.msra.mxu1 %v7546_v12  ;;  %6079 = vmatprep.mubr.f32.mxu1 %v7179_v24 }
 0x36b   :  { %6633 = vmatprep.subr.bf16.mxu1 %v7553_v52 }
 0x36d   :  { %6080 = vmatmul.mubr.f32.gmra.mrb[6].mxu1 %v7191_v31 }
 0x36e   :  { %6635 = vmatpush3.bf16.msra.mxu1 %v7553_v52  ;;  %6090 = vmatprep.mubr.f32.mxu1 %v7182_v25 }
 0x36f   :  { %6637 = vmatprep.subr.bf16.mxu1 %v6636_v3 }
 0x371   :  { %6091 = vmatmul.mubr.f32.vlgmr.msra.gmra.mrb[4].mxu1 %v7188_v30 }
 0x372   :  { %6639 = vmatpush3.bf16.msra.mxu1 %v6636_v3  ;;  %6093 = vmatprep.mubr.f32.mxu1 %v7199_v39 }
 0x373   :  { %6641 = vmatprep.subr.bf16.mxu1 %v6640_v43 }
 0x375   :  { %6094 = vmatmul.mubr.f32.gmra.mrb[6].mxu1 %v7214_v46 }
 0x376   :  { %6643 = vmatpush3.bf16.msra.mxu1 %v6640_v43  ;;  %6104 = vmatprep.mubr.f32.mxu1 %v7153_v13 }
 0x377   :  { %6645 = vmatprep.subr.bf16.mxu1 %v7546_v12 }
 0x379   :  { %6105 = vmatmul.mubr.f32.vlgmr.msra.gmra.mrb[4].mxu1 %v7155_v14 }
 0x37a   :  { %6647 = vmatpush3.bf16.msra.mxu1 %v7546_v12  ;;  %6107 = vmatprep.mubr.f32.mxu1 %v7162_v18 }
 0x37b   :  { %6649 = vmatprep.subr.bf16.mxu1 %v7553_v52 }
 0x37d   :  { %6108 = vmatmul.mubr.f32.gmra.mrb[6].mxu1 %v7164_v19 }
 0x37e   :  { %6651 = vmatpush3.bf16.msra.mxu1 %v7553_v52  ;;  %6118 = vmatprep.mubr.f32.mxu1 %v7153_v13 }
 0x381   :  { %6119 = vmatmul.mubr.f32.vlgmr.msra.gmra.mrb[4].mxu1 %v7155_v14 }
 0x382   :  { %6121 = vmatprep.mubr.f32.mxu1 %v7162_v18 }
 0x385   :  { %6122 = vmatmul.mubr.f32.gmra.mrb[6].mxu1 %v7164_v19 }
 0x386   :  { %6216 = vmatprep.mubr.f32.mxu1 %v7203_v41 }
 0x454   :  { %v6120_v36 = vpop.f32.mrb[4].mxu1 }
 0x455   :  { %v2738_v12 = vadd.f32 %v6120_v36, %v7337_v47  ;;  %v2715_v38 = vpop.f32.mrb[5].mxu1 }
 0x456   :  { %v2737_v53 = vadd.f32 %v2715_v38, %v7340_v48 }
 0x457   :  { %7031 = vtanh.f32 %v2738_v12 }
 0x458   :  { %7033 = vtanh.f32 %v2737_v53  ;;  %v6123_v6 = vpop.f32.mrb[6].mxu1 }
 0x459   :  { %v2740_v49 = vadd.f32 %v6123_v6, %v7365_v15  ;;  %v2727_v55 = vpop.f32.mrb[7].mxu1 }
 0x45a   :  { %v2739_v23 = vadd.f32 %v2727_v55, %v7356_v9 }
 0x45b   :  { %7035 = vtanh.f32 %v2740_v49 }
 0x45c   :  { %7037 = vtanh.f32 %v2739_v23 }
 0x461   :  { %v7032_v44 = vpop.eup %7031 }
 0x462   :  { %v7034_v52 = vpop.eup %7033  ;;  %v2746_v35 = vmul.f32 %v7032_v44, %v7418_v17  ;;  %v2781_v34 = vand.u32 4294901760, %v7032_v44 }
 0x463   :  { %v2745_v47 = vmul.f32 %v7034_v52, %v7420_v29  ;;  %v2778_v57 = vand.u32 4294901760, %v7034_v52 }
 0x464   :  { %v2750_v48 = vsel %vm38_vm0, %v2746_v35, 0.0  ;;  %v2895_v11 = vsub.f32 %v7032_v44, %v2781_v34 }
 0x465   :  { %v7036_v60 = vpop.eup %7035  ;;  %v2749_v3 = vsel %vm38_vm0, %v2745_v47, 0.0  ;;  %v7603_v15 = vpack.c.bf16 %v2781_v34, %v2778_v57  ;;  %v2888_v33 = vsub.f32 %v7034_v52, %v2778_v57 }
 0x466   :  { %v7038_v9 = vpop.eup %7037  ;;  %v2751_v56 = vadd.f32 %v2750_v48, %v2749_v3  ;;  %v2748_v62 = vmul.f32 %v7036_v60, %v7425_v16  ;;  %v2787_v50 = vand.u32 4294901760, %v7036_v60  ;;  %v2896_v20 = vand.u32 4294901760, %v2895_v11 }
 0x467   :  { %v2747_v4 = vmul.f32 %v7038_v9, %v7430_v37  ;;  %6653 = vmatprep.subr.bf16.mxu0 %v7603_v15  ;;  %v2784_v5 = vand.u32 4294901760, %v7038_v9  ;;  %v2889_v10 = vand.u32 4294901760, %v2888_v33  ;;  %v6668_v43 = vpack.c.bf16 %v2895_v11, %v2888_v33 }
 0x468   :  { %6655 = vmatpush3.bf16.msra.mxu0 %v7603_v15  ;;  %v2897_v61 = vsub.f32 %v2895_v11, %v2896_v20  ;;  %v2909_v45 = vsub.f32 %v7036_v60, %v2787_v50  ;;  %v2754_v36 = vsel %vm38_vm0, %v2748_v62, 0.0 }
 0x469   :  { %v2752_v63 = vsel %vm38_vm0, %v2747_v4, 0.0  ;;  %v7610_v1 = vpack.c.bf16 %v2787_v50, %v2784_v5  ;;  %v2890_v51 = vsub.f32 %v2888_v33, %v2889_v10  ;;  %v2902_v40 = vsub.f32 %v7038_v9, %v2784_v5 }
 0x46a   :  { %v2753_v8 = vadd.f32 %v2752_v63, %v2751_v56  ;;  %v2898_v54 = vand.u32 4294901760, %v2897_v61  ;;  %v2910_v42 = vand.u32 4294901760, %v2909_v45  ;;  %v6684_v0 = vpack.c.bf16 %v2896_v20, %v2889_v10 }
 0x46b   :  { %6657 = vmatprep.subr.bf16.mxu0 %v7610_v1  ;;  %v2891_v12 = vand.u32 4294901760, %v2890_v51  ;;  %v2903_v38 = vand.u32 4294901760, %v2902_v40  ;;  %v6672_v53 = vpack.c.bf16 %v2909_v45, %v2902_v40 }
 0x46c   :  { %v2755_v6 = vadd.f32 %v2754_v36, %v2753_v8  ;;  %6659 = vmatpush3.bf16.msra.mxu0 %v7610_v1  ;;  %v2911_v49 = vsub.f32 %v2909_v45, %v2910_v42 }
 0x46d   :  { %v6660_v55 = vpack.c.bf16 %v2898_v54, %v2891_v12  ;;  %v2904_v23 = vsub.f32 %v2902_v40, %v2903_v38  ;;  %v6688_v44 = vpack.c.bf16 %v2910_v42, %v2903_v38 }
 0x46e   :  { %v2756_v52 = vrot.slane %v2755_v6, 4  ;;  %v2912_v35 = vand.u32 4294901760, %v2911_v49 }
 0x46f   :  { %6133 = vmatmul.mubr.f32.vlgmr.msra.gmra.mrb[8].mxu0 %v7239_v58  ;;  %6661 = vmatprep.subr.bf16.mxu0 %v6660_v55  ;;  %v2905_v34 = vand.u32 4294901760, %v2904_v23 }
 0x470   :  { %v2757_v47 = vadd.f32 %v2756_v52, %v2755_v6  ;;  %6663 = vmatpush3.bf16.msra.mxu0 %v6660_v55  ;;  %6135 = vmatprep.mubr.f32.mxu0 %v7252_v2 }
 0x471   :  { %v6664_v57 = vpack.c.bf16 %v2912_v35, %v2905_v34 }
 0x472   :  { %v2758_v48 = vrot.slane %v2757_v47, 2 }
 0x473   :  { %6136 = vmatmul.mubr.f32.gmra.mrb[10].mxu0 %v7258_v7  ;;  %6665 = vmatprep.subr.bf16.mxu0 %v6664_v57 }
 0x474   :  { %v2759_v11 = vadd.f32 %v2758_v48, %v2757_v47  ;;  %6667 = vmatpush3.bf16.msra.mxu0 %v6664_v57  ;;  %6146 = vmatprep.mubr.f32.mxu0 %v7153_v13 }
 0x475   :  { %6669 = vmatprep.subr.bf16.mxu0 %v6668_v43 }
 0x476   :  { %v2760_v60 = vrot.slane %v2759_v11, 1 }
 0x477   :  { %6147 = vmatmul.mubr.f32.vlgmr.msra.gmra.mrb[8].mxu0 %v7155_v14 }
 0x478   :  { %v2761_v3 = vadd.f32 %v2760_v60, %v2759_v11  ;;  %6671 = vmatpush3.bf16.msra.mxu0 %v6668_v43  ;;  %6149 = vmatprep.mubr.f32.mxu0 %v7162_v18 }
 0x479   :  { %6673 = vmatprep.subr.bf16.mxu0 %v6672_v53 }
 0x47a   :  { %v2762_v33 = vadd.f32 %v2761_v3, %v7447_v32 }
 0x47b   :  { %6150 = vmatmul.mubr.f32.gmra.mrb[10].mxu0 %v7164_v19 }
 0x47c   :  { %2763 = vst.msk [vmem:[%s7865_s7 + $0x3] sm:$0x1] %vm800_vm2, %v2762_v33  ;;  %6675 = vmatpush3.bf16.msra.mxu0 %v6672_v53  ;;  %6160 = vmatprep.mubr.f32.mxu0 %v7170_v21 }
 0x47d   :  { %6677 = vmatprep.subr.bf16.mxu0 %v7603_v15 }
 0x47f   :  { %6161 = vmatmul.mubr.f32.vlgmr.msra.gmra.mrb[8].mxu0 %v7173_v22 }
 0x480   :  { %6679 = vmatpush3.bf16.msra.mxu0 %v7603_v15  ;;  %6163 = vmatprep.mubr.f32.mxu0 %v7179_v24 }
 0x481   :  { %6681 = vmatprep.subr.bf16.mxu0 %v7610_v1 }
 0x483   :  { %6164 = vmatmul.mubr.f32.gmra.mrb[10].mxu0 %v7191_v31 }
 0x484   :  { %6683 = vmatpush3.bf16.msra.mxu0 %v7610_v1  ;;  %6174 = vmatprep.mubr.f32.mxu0 %v7182_v25 }
 0x485   :  { %6685 = vmatprep.subr.bf16.mxu0 %v6684_v0 }
 0x487   :  { %6175 = vmatmul.mubr.f32.vlgmr.msra.gmra.mrb[8].mxu0 %v7188_v30 }
 0x488   :  { %6687 = vmatpush3.bf16.msra.mxu0 %v6684_v0  ;;  %6177 = vmatprep.mubr.f32.mxu0 %v7199_v39 }
 0x489   :  { %6689 = vmatprep.subr.bf16.mxu0 %v6688_v44 }
 0x48b   :  { %6178 = vmatmul.mubr.f32.gmra.mrb[10].mxu0 %v7214_v46 }
 0x48c   :  { %6691 = vmatpush3.bf16.msra.mxu0 %v6688_v44  ;;  %6188 = vmatprep.mubr.f32.mxu0 %v7153_v13 }
 0x48d   :  { %6693 = vmatprep.subr.bf16.mxu0 %v7603_v15 }
 0x48f   :  { %6189 = vmatmul.mubr.f32.vlgmr.msra.gmra.mrb[8].mxu0 %v7155_v14 }
 0x490   :  { %6695 = vmatpush3.bf16.msra.mxu0 %v7603_v15  ;;  %6191 = vmatprep.mubr.f32.mxu0 %v7162_v18 }
 0x491   :  { %6697 = vmatprep.subr.bf16.mxu0 %v7610_v1 }
 0x493   :  { %6192 = vmatmul.mubr.f32.gmra.mrb[10].mxu0 %v7164_v19 }
 0x494   :  { %6699 = vmatpush3.bf16.msra.mxu0 %v7610_v1  ;;  %6202 = vmatprep.mubr.f32.mxu0 %v7153_v13 }
 0x497   :  { %6203 = vmatmul.mubr.f32.vlgmr.msra.gmra.mrb[8].mxu0 %v7155_v14 }
 0x498   :  { %6205 = vmatprep.mubr.f32.mxu0 %v7162_v18 }
 0x49b   :  { %6206 = vmatmul.mubr.f32.gmra.mrb[10].mxu0 %v7164_v19 }
 0x49c   :  { %6300 = vmatprep.mubr.f32.mxu0 %v7203_v41 }
 0x56a   :  { %v6204_v9 = vpop.f32.mrb[8].mxu0 }
 0x56b   :  { %v3392_v15 = vadd.f32 %v6204_v9, %v7347_v59  ;;  %v3369_v56 = vpop.f32.mrb[9].mxu0 }
 0x56c   :  { %v3391_v62 = vadd.f32 %v3369_v56, %v7371_v26 }
 0x56d   :  { %7039 = vtanh.f32 %v3392_v15 }
 0x56e   :  { %7041 = vtanh.f32 %v3391_v62  ;;  %v6207_v50 = vpop.f32.mrb[10].mxu0 }
 0x56f   :  { %v3394_v20 = vadd.f32 %v6207_v50, %v7373_v27  ;;  %v3381_v4 = vpop.f32.mrb[11].mxu0 }
 0x570   :  { %v3393_v5 = vadd.f32 %v3381_v4, %v7375_v28 }
 0x571   :  { %7043 = vtanh.f32 %v3394_v20 }
 0x572   :  { %7045 = vtanh.f32 %v3393_v5 }
 0x577   :  { %v7040_v10 = vpop.eup %7039 }
 0x578   :  { %v7042_v43 = vpop.eup %7041  ;;  %v3400_v61 = vmul.f32 %v7040_v10, %v7418_v17  ;;  %v3435_v45 = vand.u32 4294901760, %v7040_v10 }
 0x579   :  { %v3399_v59 = vmul.f32 %v7042_v43, %v7420_v29  ;;  %v3432_v63 = vand.u32 4294901760, %v7042_v43 }
 0x57a   :  { %v3404_v26 = vsel %vm38_vm0, %v3400_v61, 0.0  ;;  %v3549_v1 = vsub.f32 %v7040_v10, %v3435_v45 }
 0x57b   :  { %v7044_v51 = vpop.eup %7043  ;;  %v3403_v40 = vsel %vm38_vm0, %v3399_v59, 0.0  ;;  %v7660_v27 = vpack.c.bf16 %v3435_v45, %v3432_v63  ;;  %v3542_v8 = vsub.f32 %v7042_v43, %v3432_v63 }
 0x57c   :  { %v7046_v28 = vpop.eup %7045  ;;  %v3405_v54 = vadd.f32 %v3404_v26, %v3403_v40  ;;  %v3402_v42 = vmul.f32 %v7044_v51, %v7425_v16  ;;  %v3441_v0 = vand.u32 4294901760, %v7044_v51  ;;  %v3550_v36 = vand.u32 4294901760, %v3549_v1 }
 0x57d   :  { %v3401_v12 = vmul.f32 %v7046_v28, %v7430_v37  ;;  %6701 = vmatprep.subr.bf16.mxu1 %v7660_v27  ;;  %v3438_v38 = vand.u32 4294901760, %v7046_v28  ;;  %v3543_v53 = vand.u32 4294901760, %v3542_v8  ;;  %v6716_v6 = vpack.c.bf16 %v3549_v1, %v3542_v8 }
 0x57e   :  { %6703 = vmatpush3.bf16.msra.mxu1 %v7660_v27  ;;  %v3551_v49 = vsub.f32 %v3549_v1, %v3550_v36  ;;  %v3563_v55 = vsub.f32 %v7044_v51, %v3441_v0  ;;  %v3408_v11 = vsel %vm38_vm0, %v3402_v42, 0.0  ;;  %v7879_v51 = vld [vmem:[#allocation4_spill] sm:$0xff]  ;;  %v7881_v42 = vld [vmem:[#allocation6_spill] sm:$0xff] }
 0x57f   :  { %v3406_v23 = vsel %vm38_vm0, %v3401_v12, 0.0  ;;  %v7667_v44 = vpack.c.bf16 %v3441_v0, %v3438_v38  ;;  %v3544_v52 = vsub.f32 %v3542_v8, %v3543_v53  ;;  %v3556_v35 = vsub.f32 %v7046_v28, %v3438_v38  ;;  %v7880_v8 = vld [vmem:[#allocation5_spill] sm:$0xff]  ;;  %v7882_v12 = vld [vmem:[#allocation7_spill] sm:$0xff] }
 0x580   :  { %v3407_v34 = vadd.f32 %v3406_v23, %v3405_v54  ;;  %v3552_v47 = vand.u32 4294901760, %v3551_v49  ;;  %v3564_v57 = vand.u32 4294901760, %v3563_v55  ;;  %v6732_v48 = vpack.c.bf16 %v3550_v36, %v3543_v53 }
 0x581   :  { %6705 = vmatprep.subr.bf16.mxu1 %v7667_v44  ;;  %v3545_v60 = vand.u32 4294901760, %v3544_v52  ;;  %v3557_v3 = vand.u32 4294901760, %v3556_v35  ;;  %v6720_v33 = vpack.c.bf16 %v3563_v55, %v3556_v35 }
 0x582   :  { %v3409_v9 = vadd.f32 %v3408_v11, %v3407_v34  ;;  %6707 = vmatpush3.bf16.msra.mxu1 %v7667_v44  ;;  %v3565_v15 = vsub.f32 %v3563_v55, %v3564_v57 }
 0x583   :  { %v6708_v56 = vpack.c.bf16 %v3552_v47, %v3545_v60  ;;  %v3558_v62 = vsub.f32 %v3556_v35, %v3557_v3  ;;  %v6736_v50 = vpack.c.bf16 %v3564_v57, %v3557_v3 }
 0x584   :  { %v3410_v20 = vrot.slane %v3409_v9, 4  ;;  %v3566_v4 = vand.u32 4294901760, %v3565_v15 }
 0x585   :  { %6217 = vmatmul.mubr.f32.vlgmr.msra.gmra.mrb[8].mxu1 %v7239_v58  ;;  %6709 = vmatprep.subr.bf16.mxu1 %v6708_v56  ;;  %v3559_v5 = vand.u32 4294901760, %v3558_v62 }
 0x586   :  { %v3411_v10 = vadd.f32 %v3410_v20, %v3409_v9  ;;  %6711 = vmatpush3.bf16.msra.mxu1 %v6708_v56  ;;  %6219 = vmatprep.mubr.f32.mxu1 %v7252_v2 }
 0x587   :  { %v6712_v43 = vpack.c.bf16 %v3566_v4, %v3559_v5 }
 0x588   :  { %v3412_v61 = vrot.slane %v3411_v10, 2 }
 0x589   :  { %6220 = vmatmul.mubr.f32.gmra.mrb[10].mxu1 %v7258_v7  ;;  %6713 = vmatprep.subr.bf16.mxu1 %v6712_v43 }
 0x58a   :  { %v3413_v45 = vadd.f32 %v3412_v61, %v3411_v10  ;;  %6715 = vmatpush3.bf16.msra.mxu1 %v6712_v43  ;;  %6230 = vmatprep.mubr.f32.mxu1 %v7153_v13 }
 0x58b   :  { %6717 = vmatprep.subr.bf16.mxu1 %v6716_v6 }
 0x58c   :  { %v3414_v59 = vrot.slane %v3413_v45, 1 }
 0x58d   :  { %6231 = vmatmul.mubr.f32.vlgmr.msra.gmra.mrb[8].mxu1 %v7155_v14 }
 0x58e   :  { %v3415_v63 = vadd.f32 %v3414_v59, %v3413_v45  ;;  %6719 = vmatpush3.bf16.msra.mxu1 %v6716_v6  ;;  %6233 = vmatprep.mubr.f32.mxu1 %v7162_v18 }
 0x58f   :  { %6721 = vmatprep.subr.bf16.mxu1 %v6720_v33 }
 0x590   :  { %v3416_v26 = vadd.f32 %v3415_v63, %v7447_v32 }
 0x591   :  { %6234 = vmatmul.mubr.f32.gmra.mrb[10].mxu1 %v7164_v19 }
 0x592   :  { %3417 = vst.msk [vmem:[%s7865_s7 + $0x4] sm:$0x1] %vm800_vm2, %v3416_v26  ;;  %6723 = vmatpush3.bf16.msra.mxu1 %v6720_v33  ;;  %6244 = vmatprep.mubr.f32.mxu1 %v7170_v21 }
 0x593   :  { %6725 = vmatprep.subr.bf16.mxu1 %v7660_v27 }
 0x595   :  { %6245 = vmatmul.mubr.f32.vlgmr.msra.gmra.mrb[8].mxu1 %v7173_v22 }
 0x596   :  { %6727 = vmatpush3.bf16.msra.mxu1 %v7660_v27  ;;  %6247 = vmatprep.mubr.f32.mxu1 %v7179_v24 }
 0x597   :  { %6729 = vmatprep.subr.bf16.mxu1 %v7667_v44 }
 0x599   :  { %6248 = vmatmul.mubr.f32.gmra.mrb[10].mxu1 %v7191_v31 }
 0x59a   :  { %6731 = vmatpush3.bf16.msra.mxu1 %v7667_v44  ;;  %6258 = vmatprep.mubr.f32.mxu1 %v7182_v25 }
 0x59b   :  { %6733 = vmatprep.subr.bf16.mxu1 %v6732_v48 }
 0x59d   :  { %6259 = vmatmul.mubr.f32.vlgmr.msra.gmra.mrb[8].mxu1 %v7188_v30 }
 0x59e   :  { %6735 = vmatpush3.bf16.msra.mxu1 %v6732_v48  ;;  %6261 = vmatprep.mubr.f32.mxu1 %v7199_v39 }
 0x59f   :  { %6737 = vmatprep.subr.bf16.mxu1 %v6736_v50 }
 0x5a1   :  { %6262 = vmatmul.mubr.f32.gmra.mrb[10].mxu1 %v7214_v46 }
 0x5a2   :  { %6739 = vmatpush3.bf16.msra.mxu1 %v6736_v50  ;;  %6272 = vmatprep.mubr.f32.mxu1 %v7153_v13 }
 0x5a3   :  { %6741 = vmatprep.subr.bf16.mxu1 %v7660_v27 }
 0x5a5   :  { %6273 = vmatmul.mubr.f32.vlgmr.msra.gmra.mrb[8].mxu1 %v7155_v14 }
 0x5a6   :  { %6743 = vmatpush3.bf16.msra.mxu1 %v7660_v27  ;;  %6275 = vmatprep.mubr.f32.mxu1 %v7162_v18 }
 0x5a7   :  { %6745 = vmatprep.subr.bf16.mxu1 %v7667_v44 }
 0x5a9   :  { %6276 = vmatmul.mubr.f32.gmra.mrb[10].mxu1 %v7164_v19 }
 0x5aa   :  { %6747 = vmatpush3.bf16.msra.mxu1 %v7667_v44  ;;  %6286 = vmatprep.mubr.f32.mxu1 %v7153_v13 }
 0x5ad   :  { %6287 = vmatmul.mubr.f32.vlgmr.msra.gmra.mrb[8].mxu1 %v7155_v14 }
 0x5ae   :  { %6289 = vmatprep.mubr.f32.mxu1 %v7162_v18 }
 0x5b1   :  { %6290 = vmatmul.mubr.f32.gmra.mrb[10].mxu1 %v7164_v19 }
 0x5b2   :  { %6384 = vmatprep.mubr.f32.mxu1 %v7203_v41 }
 0x680   :  { %v6288_v1 = vpop.f32.mrb[8].mxu1 }
 0x681   :  { %v4046_v40 = vadd.f32 %v6288_v1, %v7879_v51  ;;  %v4023_v27 = vpop.f32.mrb[9].mxu1 }
 0x682   :  { %v4045_v28 = vadd.f32 %v4023_v27, %v7880_v8 }
 0x683   :  { %7047 = vtanh.f32 %v4046_v40 }
 0x684   :  { %7049 = vtanh.f32 %v4045_v28  ;;  %v6291_v54 = vpop.f32.mrb[10].mxu1 }
 0x685   :  { %v4048_v0 = vadd.f32 %v6291_v54, %v7881_v42  ;;  %v4035_v36 = vpop.f32.mrb[11].mxu1 }
 0x686   :  { %v4047_v38 = vadd.f32 %v4035_v36, %v7882_v12 }
 0x687   :  { %7051 = vtanh.f32 %v4048_v0 }
 0x688   :  { %7053 = vtanh.f32 %v4047_v38 }
 0x68d   :  { %v7048_v53 = vpop.eup %7047 }
 0x68e   :  { %v7050_v6 = vpop.eup %7049  ;;  %v4054_v41 = vmul.f32 %v7048_v53, %v7418_v17  ;;  %v4089_v49 = vand.u32 4294901760, %v7048_v53 }
 0x68f   :  { %v4053_v55 = vmul.f32 %v7050_v6, %v7420_v29  ;;  %v4086_v23 = vand.u32 4294901760, %v7050_v6 }
 0x690   :  { %v4058_v44 = vsel %vm38_vm0, %v4054_v41, 0.0  ;;  %v4203_v52 = vsub.f32 %v7048_v53, %v4089_v49 }
 0x691   :  { %v7052_v35 = vpop.eup %7051  ;;  %v4057_v34 = vsel %vm38_vm0, %v4053_v55, 0.0  ;;  %v7717_v47 = vpack.c.bf16 %v4089_v49, %v4086_v23  ;;  %v4196_v57 = vsub.f32 %v7050_v6, %v4086_v23 }
 0x692   :  { %v7054_v48 = vpop.eup %7053  ;;  %v4059_v11 = vadd.f32 %v4058_v44, %v4057_v34  ;;  %v4056_v60 = vmul.f32 %v7052_v35, %v7425_v16  ;;  %v4095_v3 = vand.u32 4294901760, %v7052_v35  ;;  %v4204_v33 = vand.u32 4294901760, %v4203_v52 }
 0x693   :  { %v4055_v9 = vmul.f32 %v7054_v48, %v7430_v37  ;;  %6749 = vmatprep.subr.bf16.mxu0 %v7717_v47  ;;  %v4092_v15 = vand.u32 4294901760, %v7054_v48  ;;  %v4197_v56 = vand.u32 4294901760, %v4196_v57  ;;  %v6764_v62 = vpack.c.bf16 %v4203_v52, %v4196_v57 }
 0x694   :  { %6751 = vmatpush3.bf16.msra.mxu0 %v7717_v47  ;;  %v4205_v50 = vsub.f32 %v4203_v52, %v4204_v33  ;;  %v4217_v20 = vsub.f32 %v7052_v35, %v4095_v3  ;;  %v4062_v26 = vsel %vm38_vm0, %v4056_v60, 0.0  ;;  %v7883_v52 = vld [vmem:[#allocation8_spill] sm:$0xff] }
 0x695   :  { %v4060_v4 = vsel %vm38_vm0, %v4055_v9, 0.0  ;;  %v7724_v5 = vpack.c.bf16 %v4095_v3, %v4092_v15  ;;  %v4198_v10 = vsub.f32 %v4196_v57, %v4197_v56  ;;  %v4210_v43 = vsub.f32 %v7054_v48, %v4092_v15 }
 0x696   :  { %v4061_v61 = vadd.f32 %v4060_v4, %v4059_v11  ;;  %v4206_v45 = vand.u32 4294901760, %v4205_v50  ;;  %v4218_v59 = vand.u32 4294901760, %v4217_v20  ;;  %v6780_v63 = vpack.c.bf16 %v4204_v33, %v4197_v56  ;;  %v7885_v11 = vld [vmem:[#allocation10_spill] sm:$0xff]  ;;  %v7886_v33 = vld [vmem:[#allocation11_spill] sm:$0xff] }
 0x697   :  { %6753 = vmatprep.subr.bf16.mxu0 %v7724_v5  ;;  %v4199_v1 = vand.u32 4294901760, %v4198_v10  ;;  %v4211_v51 = vand.u32 4294901760, %v4210_v43  ;;  %v6768_v40 = vpack.c.bf16 %v4217_v20, %v4210_v43 }
 0x698   :  { %v4063_v27 = vadd.f32 %v4062_v26, %v4061_v61  ;;  %6755 = vmatpush3.bf16.msra.mxu0 %v7724_v5  ;;  %v4219_v8 = vsub.f32 %v4217_v20, %v4218_v59 }
 0x699   :  { %v6756_v28 = vpack.c.bf16 %v4206_v45, %v4199_v1  ;;  %v4212_v54 = vsub.f32 %v4210_v43, %v4211_v51  ;;  %v6784_v42 = vpack.c.bf16 %v4218_v59, %v4211_v51 }
 0x69a   :  { %v4064_v0 = vrot.slane %v4063_v27, 4  ;;  %v4220_v36 = vand.u32 4294901760, %v4219_v8 }
 0x69b   :  { %6301 = vmatmul.mubr.f32.vlgmr.msra.gmra.mrb[12].mxu0 %v7239_v58  ;;  %6757 = vmatprep.subr.bf16.mxu0 %v6756_v28  ;;  %v4213_v12 = vand.u32 4294901760, %v4212_v54 }
 0x69c   :  { %v4065_v38 = vadd.f32 %v4064_v0, %v4063_v27  ;;  %6759 = vmatpush3.bf16.msra.mxu0 %v6756_v28  ;;  %6303 = vmatprep.mubr.f32.mxu0 %v7252_v2 }
 0x69d   :  { %v6760_v53 = vpack.c.bf16 %v4220_v36, %v4213_v12 }
 0x69e   :  { %v4066_v6 = vrot.slane %v4065_v38, 2 }
 0x69f   :  { %6304 = vmatmul.mubr.f32.gmra.mrb[14].mxu0 %v7258_v7  ;;  %6761 = vmatprep.subr.bf16.mxu0 %v6760_v53 }
 0x6a0   :  { %v4067_v41 = vadd.f32 %v4066_v6, %v4065_v38  ;;  %6763 = vmatpush3.bf16.msra.mxu0 %v6760_v53  ;;  %6314 = vmatprep.mubr.f32.mxu0 %v7153_v13 }
 0x6a1   :  { %6765 = vmatprep.subr.bf16.mxu0 %v6764_v62 }
 0x6a2   :  { %v4068_v49 = vrot.slane %v4067_v41, 1 }
 0x6a3   :  { %6315 = vmatmul.mubr.f32.vlgmr.msra.gmra.mrb[12].mxu0 %v7155_v14 }
 0x6a4   :  { %v4069_v55 = vadd.f32 %v4068_v49, %v4067_v41  ;;  %6767 = vmatpush3.bf16.msra.mxu0 %v6764_v62  ;;  %6317 = vmatprep.mubr.f32.mxu0 %v7162_v18 }
 0x6a5   :  { %6769 = vmatprep.subr.bf16.mxu0 %v6768_v40 }
 0x6a6   :  { %v4070_v23 = vadd.f32 %v4069_v55, %v7447_v32 }
 0x6a7   :  { %6318 = vmatmul.mubr.f32.gmra.mrb[14].mxu0 %v7164_v19 }
 0x6a8   :  { %4071 = vst.msk [vmem:[%s7865_s7 + $0x5] sm:$0x1] %vm800_vm2, %v4070_v23  ;;  %6771 = vmatpush3.bf16.msra.mxu0 %v6768_v40  ;;  %6328 = vmatprep.mubr.f32.mxu0 %v7170_v21 }
 0x6a9   :  { %6773 = vmatprep.subr.bf16.mxu0 %v7717_v47 }
 0x6ab   :  { %6329 = vmatmul.mubr.f32.vlgmr.msra.gmra.mrb[12].mxu0 %v7173_v22 }
 0x6ac   :  { %6775 = vmatpush3.bf16.msra.mxu0 %v7717_v47  ;;  %6331 = vmatprep.mubr.f32.mxu0 %v7179_v24 }
 0x6ad   :  { %6777 = vmatprep.subr.bf16.mxu0 %v7724_v5 }
 0x6af   :  { %6332 = vmatmul.mubr.f32.gmra.mrb[14].mxu0 %v7191_v31 }
 0x6b0   :  { %6779 = vmatpush3.bf16.msra.mxu0 %v7724_v5  ;;  %6342 = vmatprep.mubr.f32.mxu0 %v7182_v25 }
 0x6b1   :  { %6781 = vmatprep.subr.bf16.mxu0 %v6780_v63 }
 0x6b3   :  { %6343 = vmatmul.mubr.f32.vlgmr.msra.gmra.mrb[12].mxu0 %v7188_v30 }
 0x6b4   :  { %6783 = vmatpush3.bf16.msra.mxu0 %v6780_v63  ;;  %6345 = vmatprep.mubr.f32.mxu0 %v7199_v39 }
 0x6b5   :  { %6785 = vmatprep.subr.bf16.mxu0 %v6784_v42 }
 0x6b7   :  { %6346 = vmatmul.mubr.f32.gmra.mrb[14].mxu0 %v7214_v46 }
 0x6b8   :  { %6787 = vmatpush3.bf16.msra.mxu0 %v6784_v42  ;;  %6356 = vmatprep.mubr.f32.mxu0 %v7153_v13 }
 0x6b9   :  { %6789 = vmatprep.subr.bf16.mxu0 %v7717_v47 }
 0x6bb   :  { %6357 = vmatmul.mubr.f32.vlgmr.msra.gmra.mrb[12].mxu0 %v7155_v14 }
 0x6bc   :  { %6791 = vmatpush3.bf16.msra.mxu0 %v7717_v47  ;;  %6359 = vmatprep.mubr.f32.mxu0 %v7162_v18  ;;  %v7884_v47 = vld [vmem:[#allocation9_spill] sm:$0xff] }
 0x6bd   :  { %6793 = vmatprep.subr.bf16.mxu0 %v7724_v5 }
 0x6bf   :  { %6360 = vmatmul.mubr.f32.gmra.mrb[14].mxu0 %v7164_v19 }
 0x6c0   :  { %6795 = vmatpush3.bf16.msra.mxu0 %v7724_v5  ;;  %6370 = vmatprep.mubr.f32.mxu0 %v7153_v13 }
 0x6c3   :  { %6371 = vmatmul.mubr.f32.vlgmr.msra.gmra.mrb[12].mxu0 %v7155_v14 }
 0x6c4   :  { %6373 = vmatprep.mubr.f32.mxu0 %v7162_v18 }
 0x6c7   :  { %6374 = vmatmul.mubr.f32.gmra.mrb[14].mxu0 %v7164_v19 }
 0x796   :  { %v6372_v44 = vpop.f32.mrb[12].mxu0 }
 0x797   :  { %v4700_v35 = vadd.f32 %v6372_v44, %v7883_v52  ;;  %v4677_v34 = vpop.f32.mrb[13].mxu0 }
 0x798   :  { %v4699_v57 = vadd.f32 %v4677_v34, %v7884_v47 }
 0x799   :  { %7055 = vtanh.f32 %v4700_v35 }
 0x79a   :  { %7057 = vtanh.f32 %v4699_v57  ;;  %v6375_v48 = vpop.f32.mrb[14].mxu0 }
 0x79b   :  { %v4702_v60 = vadd.f32 %v6375_v48, %v7885_v11  ;;  %v4689_v3 = vpop.f32.mrb[15].mxu0 }
 0x79c   :  { %v4701_v9 = vadd.f32 %v4689_v3, %v7886_v33 }
 0x79d   :  { %7059 = vtanh.f32 %v4702_v60 }
 0x79e   :  { %7061 = vtanh.f32 %v4701_v9 }
 0x7a3   :  { %v7056_v15 = vpop.eup %7055 }
 0x7a4   :  { %v7058_v56 = vpop.eup %7057  ;;  %v4708_v62 = vmul.f32 %v7056_v15, %v7418_v17  ;;  %v4743_v50 = vand.u32 4294901760, %v7056_v15 }
 0x7a5   :  { %v4707_v20 = vmul.f32 %v7058_v56, %v7420_v29  ;;  %v4740_v4 = vand.u32 4294901760, %v7058_v56 }
 0x7a6   :  { %v4712_v5 = vsel %vm38_vm0, %v4708_v62, 0.0  ;;  %v4857_v10 = vsub.f32 %v7056_v15, %v4743_v50 }
 0x7a7   :  { %v7060_v43 = vpop.eup %7059  ;;  %v4711_v61 = vsel %vm38_vm0, %v4707_v20, 0.0  ;;  %v7773_v45 = vpack.c.bf16 %v4743_v50, %v4740_v4  ;;  %v4850_v59 = vsub.f32 %v7058_v56, %v4740_v4  ;;  %v7890_v4 = vld [vmem:[#allocation15_spill] sm:$0xff] }
 0x7a8   :  { %v7062_v63 = vpop.eup %7061  ;;  %v4713_v26 = vadd.f32 %v4712_v5, %v4711_v61  ;;  %v4710_v1 = vmul.f32 %v7060_v43, %v7425_v16  ;;  %v4749_v51 = vand.u32 4294901760, %v7060_v43  ;;  %v4858_v40 = vand.u32 4294901760, %v4857_v10 }
 0x7a9   :  { %v4709_v27 = vmul.f32 %v7062_v63, %v7430_v37  ;;  %6797 = vmatprep.subr.bf16.mxu1 %v7773_v45  ;;  %v4746_v8 = vand.u32 4294901760, %v7062_v63  ;;  %v4851_v28 = vand.u32 4294901760, %v4850_v59  ;;  %v6812_v54 = vpack.c.bf16 %v4857_v10, %v4850_v59 }
 0x7aa   :  { %6799 = vmatpush3.bf16.msra.mxu1 %v7773_v45  ;;  %v4859_v42 = vsub.f32 %v4857_v10, %v4858_v40  ;;  %v4871_v0 = vsub.f32 %v7060_v43, %v4749_v51  ;;  %v4716_v23 = vsel %vm38_vm0, %v4710_v1, 0.0 }
 0x7ab   :  { %v4714_v36 = vsel %vm38_vm0, %v4709_v27, 0.0  ;;  %v7780_v12 = vpack.c.bf16 %v4749_v51, %v4746_v8  ;;  %v4852_v38 = vsub.f32 %v4850_v59, %v4851_v28  ;;  %v4864_v53 = vsub.f32 %v7062_v63, %v4746_v8 }
 0x7ac   :  { %v4715_v6 = vadd.f32 %v4714_v36, %v4713_v26  ;;  %v4860_v41 = vand.u32 4294901760, %v4859_v42  ;;  %v4872_v49 = vand.u32 4294901760, %v4871_v0  ;;  %v6828_v55 = vpack.c.bf16 %v4858_v40, %v4851_v28 }
 0x7ad   :  { %6801 = vmatprep.subr.bf16.mxu1 %v7780_v12  ;;  %v4853_v44 = vand.u32 4294901760, %v4852_v38  ;;  %v4865_v52 = vand.u32 4294901760, %v4864_v53  ;;  %v6816_v35 = vpack.c.bf16 %v4871_v0, %v4864_v53 }
 0x7ae   :  { %v4717_v34 = vadd.f32 %v4716_v23, %v4715_v6  ;;  %6803 = vmatpush3.bf16.msra.mxu1 %v7780_v12  ;;  %v4873_v47 = vsub.f32 %v4871_v0, %v4872_v49 }
 0x7af   :  { %v6804_v57 = vpack.c.bf16 %v4860_v41, %v4853_v44  ;;  %v4866_v48 = vsub.f32 %v4864_v53, %v4865_v52  ;;  %v6832_v11 = vpack.c.bf16 %v4872_v49, %v4865_v52 }
 0x7b0   :  { %v4718_v60 = vrot.slane %v4717_v34, 4  ;;  %v4874_v3 = vand.u32 4294901760, %v4873_v47 }
 0x7b1   :  { %6385 = vmatmul.mubr.f32.vlgmr.msra.gmra.mrb[12].mxu1 %v7239_v58  ;;  %6805 = vmatprep.subr.bf16.mxu1 %v6804_v57  ;;  %v4867_v33 = vand.u32 4294901760, %v4866_v48 }
 0x7b2   :  { %v4719_v9 = vadd.f32 %v4718_v60, %v4717_v34  ;;  %6807 = vmatpush3.bf16.msra.mxu1 %v6804_v57  ;;  %6387 = vmatprep.mubr.f32.mxu1 %v7252_v2 }
 0x7b3   :  { %v6808_v15 = vpack.c.bf16 %v4874_v3, %v4867_v33 }
 0x7b4   :  { %v4720_v56 = vrot.slane %v4719_v9, 2 }
 0x7b5   :  { %6388 = vmatmul.mubr.f32.gmra.mrb[14].mxu1 %v7258_v7  ;;  %6809 = vmatprep.subr.bf16.mxu1 %v6808_v15 }
 0x7b6   :  { %v4721_v62 = vadd.f32 %v4720_v56, %v4719_v9  ;;  %6811 = vmatpush3.bf16.msra.mxu1 %v6808_v15  ;;  %6398 = vmatprep.mubr.f32.mxu1 %v7153_v13 }
 0x7b7   :  { %6813 = vmatprep.subr.bf16.mxu1 %v6812_v54 }
 0x7b8   :  { %v4722_v50 = vrot.slane %v4721_v62, 1 }
 0x7b9   :  { %6399 = vmatmul.mubr.f32.vlgmr.msra.gmra.mrb[12].mxu1 %v7155_v14 }
 0x7ba   :  { %v4723_v58 = vadd.f32 %v4722_v50, %v4721_v62  ;;  %6815 = vmatpush3.bf16.msra.mxu1 %v6812_v54  ;;  %6401 = vmatprep.mubr.f32.mxu1 %v7162_v18 }
 0x7bb   :  { %6817 = vmatprep.subr.bf16.mxu1 %v6816_v35 }
 0x7bc   :  { %v4724_v2 = vadd.f32 %v4723_v58, %v7447_v32 }
 0x7bd   :  { %6402 = vmatmul.mubr.f32.gmra.mrb[14].mxu1 %v7164_v19 }
 0x7be   :  { %4725 = vst.msk [vmem:[%s7865_s7 + $0x6] sm:$0x1] %vm800_vm2, %v4724_v2  ;;  %6819 = vmatpush3.bf16.msra.mxu1 %v6816_v35  ;;  %6412 = vmatprep.mubr.f32.mxu1 %v7170_v21 }
 0x7bf   :  { %6821 = vmatprep.subr.bf16.mxu1 %v7773_v45 }
 0x7c1   :  { %6413 = vmatmul.mubr.f32.vlgmr.msra.gmra.mrb[12].mxu1 %v7173_v22  ;;  %v7887_v22 = vld [vmem:[#allocation12_spill] sm:$0xff] }
 0x7c2   :  { %6823 = vmatpush3.bf16.msra.mxu1 %v7773_v45  ;;  %6415 = vmatprep.mubr.f32.mxu1 %v7179_v24 }
 0x7c3   :  { %6825 = vmatprep.subr.bf16.mxu1 %v7780_v12 }
 0x7c5   :  { %6416 = vmatmul.mubr.f32.gmra.mrb[14].mxu1 %v7191_v31 }
 0x7c6   :  { %6827 = vmatpush3.bf16.msra.mxu1 %v7780_v12  ;;  %6426 = vmatprep.mubr.f32.mxu1 %v7182_v25 }
 0x7c7   :  { %6829 = vmatprep.subr.bf16.mxu1 %v6828_v55 }
 0x7c9   :  { %6427 = vmatmul.mubr.f32.vlgmr.msra.gmra.mrb[12].mxu1 %v7188_v30  ;;  %v7888_v30 = vld [vmem:[#allocation13_spill] sm:$0xff] }
 0x7ca   :  { %6831 = vmatpush3.bf16.msra.mxu1 %v6828_v55  ;;  %6429 = vmatprep.mubr.f32.mxu1 %v7199_v39 }
 0x7cb   :  { %6833 = vmatprep.subr.bf16.mxu1 %v6832_v11 }
 0x7cd   :  { %6430 = vmatmul.mubr.f32.gmra.mrb[14].mxu1 %v7214_v46  ;;  %v7889_v46 = vld [vmem:[#allocation14_spill] sm:$0xff] }
 0x7ce   :  { %6835 = vmatpush3.bf16.msra.mxu1 %v6832_v11  ;;  %6440 = vmatprep.mubr.f32.mxu1 %v7153_v13 }
 0x7cf   :  { %6837 = vmatprep.subr.bf16.mxu1 %v7773_v45 }
 0x7d1   :  { %6441 = vmatmul.mubr.f32.vlgmr.msra.gmra.mrb[12].mxu1 %v7155_v14 }
 0x7d2   :  { %6839 = vmatpush3.bf16.msra.mxu1 %v7773_v45  ;;  %6443 = vmatprep.mubr.f32.mxu1 %v7162_v18 }
 0x7d3   :  { %6841 = vmatprep.subr.bf16.mxu1 %v7780_v12 }
 0x7d5   :  { %6444 = vmatmul.mubr.f32.gmra.mrb[14].mxu1 %v7164_v19 }
 0x7d6   :  { %6843 = vmatpush3.bf16.msra.mxu1 %v7780_v12  ;;  %6454 = vmatprep.mubr.f32.mxu1 %v7153_v13 }
 0x7d9   :  { %6455 = vmatmul.mubr.f32.vlgmr.msra.gmra.mrb[12].mxu1 %v7155_v14 }
 0x7da   :  { %6457 = vmatprep.mubr.f32.mxu1 %v7162_v18 }
 0x7dd   :  { %6458 = vmatmul.mubr.f32.gmra.mrb[14].mxu1 %v7164_v19 }
 0x8ac   :  { %v6456_v21 = vpop.f32.mrb[12].mxu1 }
 0x8ad   :  { %v5354_v24 = vadd.f32 %v6456_v21, %v7887_v22  ;;  %v5331_v25 = vpop.f32.mrb[13].mxu1 }
 0x8ae   :  { %v5353_v31 = vadd.f32 %v5331_v25, %v7888_v30 }
 0x8af   :  { %7063 = vtanh.f32 %v5354_v24 }
 0x8b0   :  { %7065 = vtanh.f32 %v5353_v31  ;;  %v6459_v39 = vpop.f32.mrb[14].mxu1 }
 0x8b1   :  { %v5356_v7 = vadd.f32 %v6459_v39, %v7889_v46  ;;  %v5343_v20 = vpop.f32.mrb[15].mxu1 }
 0x8b2   :  { %v5355_v13 = vadd.f32 %v5343_v20, %v7890_v4 }
 0x8b3   :  { %7067 = vtanh.f32 %v5356_v7 }
 0x8b4   :  { %7069 = vtanh.f32 %v5355_v13 }
 0x8b9   :  { %v7064_v14 = vpop.eup %7063 }
 0x8ba   :  { %v7066_v18 = vpop.eup %7065  ;;  %v5362_v19 = vmul.f32 %v7064_v14, %v7418_v17  ;;  %5381 = vst.msk [vmem:[#allocation2 + $0x8] sm:$0xff] %vm38_vm0, %v7064_v14  ;;  %5385 = vst.msk [vmem:[%s7866_s8 + $0x8] sm:$0xff] %vm38_vm0, %v7064_v14 }
 0x8bb   :  { %v5361_v5 = vmul.f32 %v7066_v18, %v7420_v29  ;;  %5380 = vst.msk [vmem:[#allocation2] sm:$0xff] %vm38_vm0, %v7066_v18  ;;  %5384 = vst.msk [vmem:[%s7866_s8] sm:$0xff] %vm38_vm0, %v7066_v18 }
 0x8bc   :  { %v5366_v10 = vsel %vm38_vm0, %v5362_v19, 0.0 }
 0x8bd   :  { %v7068_v43 = vpop.eup %7067  ;;  %v5365_v17 = vsel %vm38_vm0, %v5361_v5, 0.0 }
 0x8be   :  { %v7070_v61 = vpop.eup %7069  ;;  %v5367_v45 = vadd.f32 %v5366_v10, %v5365_v17  ;;  %5383 = vst.msk [vmem:[#allocation2 + $0x18] sm:$0xff] %vm38_vm0, %v7068_v43  ;;  %5387 = vst.msk [vmem:[%s7866_s8 + $0x18] sm:$0xff] %vm38_vm0, %v7068_v43  ;;  %v5364_v29 = vmul.f32 %v7068_v43, %v7425_v16 }
 0x8bf   :  { %v5363_v59 = vmul.f32 %v7070_v61, %v7430_v37  ;;  %5382 = vst.msk [vmem:[#allocation2 + $0x10] sm:$0xff] %vm38_vm0, %v7070_v61  ;;  %5386 = vst.msk [vmem:[%s7866_s8 + $0x10] sm:$0xff] %vm38_vm0, %v7070_v61 }
 0x8c0   :  { %v5370_v1 = vsel %vm38_vm0, %v5364_v29, 0.0 }
 0x8c1   :  { %v5368_v63 = vsel %vm38_vm0, %v5363_v59, 0.0 }
 0x8c2   :  { %v5369_v26 = vadd.f32 %v5368_v63, %v5367_v45 }
 0x8c4   :  { %v5371_v51 = vadd.f32 %v5370_v1, %v5369_v26 }
 0x8c6   :  { %v5372_v40 = vrot.slane %v5371_v51, 4 }
 0x8c8   :  { %v5373_v27 = vadd.f32 %v5372_v40, %v5371_v51 }
 0x8ca   :  { %v5374_v8 = vrot.slane %v5373_v27, 2 }
 0x8cc   :  { %v5375_v28 = vadd.f32 %v5374_v8, %v5373_v27 }
 0x8ce   :  { %v5376_v16 = vrot.slane %v5375_v28, 1 }
 0x8d0   :  { %v5377_v54 = vadd.f32 %v5376_v16, %v5375_v28 }
 0x8d2   :  { %v5378_v37 = vadd.f32 %v5377_v54, %v7447_v32 }
 0x8d4   :  { %5379 = vst.msk [vmem:[%s7865_s7 + $0x7] sm:$0x1] %vm800_vm2, %v5378_v37 }

</bundles_post_ra>
